<compile_context>
chip_gen: v5e
topology: v5e:2x2
jax: 0.10.0
libtpu: 0.0.40
codegen_flags: <defaults>
</compile_context>

<pallas_src>
import functools

import jax
import jax.numpy as jnp
from jax.experimental import pallas as pl
from jax.experimental.pallas import tpu as pltpu


_TAPS = tuple((dh, dw) for dh in (-1, 0, 1) for dw in (-1, 0, 1))


# ----------------------------------------------------------------------------
# Fused SEM_B kernel (one batch element per grid step)
# ----------------------------------------------------------------------------
def _sem_b_kernel(x_ref,
                  w1_ref, b1_ref, a1_ref,
                  dwl_ref, bl_ref, al_ref,
                  dwr_ref, br_ref, ar_ref,
                  w3_ref, b3_ref, a3_ref,
                  w4_ref, sf_ref, bf_ref, af_ref,
                  o_ref, buf_ref, *, H, W, d):
    HW = H * W
    C = x_ref.shape[1]
    C2, C4 = C // 2, C // 4
    pad = max(1, d) * (W + 1)
    P = ((pad + 127) // 128) * 128          # lane-aligned left/right pad

    # Column-validity masks, computed once (dw = -1 / +1 per dilation used).
    col = jax.lax.broadcasted_iota(jnp.int32, (1, HW), 1) % W
    valid = {}
    for dil in {1, d}:
        valid[(-1, dil)] = col >= dil
        valid[(1, dil)] = col < (W - dil)

    def prelu(v, a):                        # a: (rows, 1) per-channel slope
        return jnp.where(v > 0, v, a * v)

    def fill(r0, r1, v):                    # write v into the padded scratch
        buf_ref[r0:r1, P:P + HW] = v

    def bcast(b_ref, rows):                 # broadcast (rows,1) bias to (rows,HW)
        return jnp.broadcast_to(b_ref[...], (rows, HW))

    def tap(r0, r1, dh, dw, dil):
        # shifted zero-padded view: out[:, h*W+w] = src[:, h+dh*dil, w+dw*dil]
        sh = (dh * W + dw) * dil
        t = buf_ref[r0:r1, P + sh:P + sh + HW]
        if dw == 0:                         # row over/underflow hits zero pad
            return t
        return jnp.where(valid[(dw, dil)], t, 0.0)

    # Zero only the padding columns; the interior is always re-filled before
    # any tap reads it.
    buf_ref[:, 0:P] = jnp.zeros((C, P), jnp.float32)
    buf_ref[:, P + HW:] = jnp.zeros((C, P), jnp.float32)

    # --- conv3x3: C -> C2 (BN scale folded into weights) + bias + PReLU ------
    fill(0, C, x_ref[0])
    acc = bcast(b1_ref, C2)
    for k, (dh, dw) in enumerate(_TAPS):
        acc = acc + jnp.dot(w1_ref[k], tap(0, C, dh, dw, 1),
                            preferred_element_type=jnp.float32)
    y = prelu(acc, a1_ref[...])                                # (C2, HW)

    # --- Split + depthwise 3x3 (left) / dilated depthwise 3x3 (right) --------
    fill(0, C2, y)
    accl = bcast(bl_ref, C4)
    accr = bcast(br_ref, C4)
    for k, (dh, dw) in enumerate(_TAPS):
        accl = accl + dwl_ref[k] * tap(0, C4, dh, dw, 1)
        accr = accr + dwr_ref[k] * tap(C4, C2, dh, dw, d)
    ul = prelu(accl, al_ref[...])
    ur = prelu(accr, ar_ref[...])

    # --- conv3x3_resume.conv3x3: C2 -> C2 + bias + PReLU ----------------------
    # Write the two halves straight back into the scratch: the concat is
    # implicit in the sublane layout (no jnp.concatenate / relayout needed).
    fill(0, C4, ul)
    fill(C4, C2, ur)
    acc3 = bcast(b3_ref, C2)
    for k, (dh, dw) in enumerate(_TAPS):
        acc3 = acc3 + jnp.dot(w3_ref[k], tap(0, C2, dh, dw, 1),
                              preferred_element_type=jnp.float32)
    r = prelu(acc3, a3_ref[...])                               # (C2, HW)

    # --- conv1x1_resume (final BN scale folded) + residual + bias + PReLU -----
    z = jnp.dot(w4_ref[...], r, preferred_element_type=jnp.float32)  # (C, HW)
    z = z + x_ref[0] * sf_ref[...] + bf_ref[...]
    o_ref[0] = prelu(z, af_ref[...]).astype(o_ref.dtype)


# ----------------------------------------------------------------------------
# Wrapper: NCHW in, NCHW out; no transposes, only free reshapes.
# ----------------------------------------------------------------------------
def sem_b_forward(x, params, *, d=1):
    B, C, H, W = x.shape
    assert C % 4 == 0, "SEM_B needs nIn divisible by 4"
    C2, C4 = C // 2, C // 4
    HW = H * W
    pad = max(1, d) * (W + 1)
    P = ((pad + 127) // 128) * 128

    xf = x.reshape(B, C, HW)               # contiguous view, channels on sublanes

    def full(shape):
        return pl.BlockSpec(shape, lambda b: (0,) * len(shape))

    kernel = functools.partial(_sem_b_kernel, H=H, W=W, d=d)
    out = pl.pallas_call(
        kernel,
        out_shape=jax.ShapeDtypeStruct((B, C, HW), jnp.float32),
        grid=(B,),
        in_specs=[
            pl.BlockSpec((1, C, HW), lambda b: (b, 0, 0)),
            full((9, C2, C)),  full((C2, 1)), full((C2, 1)),
            full((9, C4, 1)),  full((C4, 1)), full((C4, 1)),
            full((9, C4, 1)),  full((C4, 1)), full((C4, 1)),
            full((9, C2, C2)), full((C2, 1)), full((C2, 1)),
            full((C, C2)),     full((C, 1)),  full((C, 1)),  full((C, 1)),
        ],
        out_specs=pl.BlockSpec((1, C, HW), lambda b: (b, 0, 0)),
        scratch_shapes=[pltpu.VMEM((C, HW + 2 * P), jnp.float32)],
        compiler_params=pltpu.CompilerParams(
            dimension_semantics=("parallel",)),
    )(xf,
      params["w1_taps"], params["b1"], params["a1"],
      params["dwl_taps"], params["bl"], params["al"],
      params["dwr_taps"], params["br"], params["ar"],
      params["w3_taps"], params["b3"], params["a3"],
      params["w4f"], params["sf"], params["bf"], params["af"])
    return out.reshape(B, C, H, W)


# ----------------------------------------------------------------------------
# Deterministic parameter init + BN folding (shapes follow the PyTorch module)
# ----------------------------------------------------------------------------
def init_params(key, C, d=1, eps=1e-3):
    C2, C4 = C // 2, C // 4
    ks = iter(jax.random.split(key, 32))

    def nrm(shape, scale):
        return jax.random.normal(next(ks), shape, jnp.float32) * scale

    def bn_init(n):
        return dict(gamma=1.0 + 0.1 * nrm((n,), 1.0),
                    beta=0.1 * nrm((n,), 1.0),
                    mean=0.1 * nrm((n,), 1.0),
                    var=1.0 + 0.1 * jnp.abs(nrm((n,), 1.0)))

    raw = dict(
        w1=nrm((C2, C, 3, 3), 0.15),  bn1=bn_init(C2), a1=jnp.full((C2,), 0.25, jnp.float32),
        dwl=nrm((C4, 1, 3, 3), 0.3),  bnl=bn_init(C4), al=jnp.full((C4,), 0.25, jnp.float32),
        dwr=nrm((C4, 1, 3, 3), 0.3),  bnr=bn_init(C4), ar=jnp.full((C4,), 0.25, jnp.float32),
        w3=nrm((C2, C2, 3, 3), 0.15), bn3=bn_init(C2), a3=jnp.full((C2,), 0.25, jnp.float32),
        w4=nrm((C, C2, 1, 1), 0.2),
        bnf=bn_init(C),               af=jnp.full((C,), 0.25, jnp.float32),
        eps=eps, d=d,
    )

    def fold(bn):
        s = bn["gamma"] / jnp.sqrt(bn["var"] + eps)
        return s, bn["beta"] - bn["mean"] * s

    def taps_oihw(w):                        # (O, I, 3, 3) -> (9, O, I)
        return jnp.transpose(w, (2, 3, 0, 1)).reshape(9, w.shape[0], w.shape[1])

    s1, b1 = fold(raw["bn1"])
    sl, bl = fold(raw["bnl"])
    sr, br = fold(raw["bnr"])
    s3, b3 = fold(raw["bn3"])
    sf, bf = fold(raw["bnf"])
    col = lambda v: v.reshape(-1, 1)

    return dict(
        w1_taps=taps_oihw(raw["w1"] * s1[:, None, None, None]),
        b1=col(b1), a1=col(raw["a1"]),
        dwl_taps=jnp.transpose(raw["dwl"][:, 0] * sl[:, None, None],
                               (1, 2, 0)).reshape(9, C4, 1),
        bl=col(bl), al=col(raw["al"]),
        dwr_taps=jnp.transpose(raw["dwr"][:, 0] * sr[:, None, None],
                               (1, 2, 0)).reshape(9, C4, 1),
        br=col(br), ar=col(raw["ar"]),
        w3_taps=taps_oihw(raw["w3"] * s3[:, None, None, None]),
        b3=col(b3), a3=col(raw["a3"]),
        w4f=raw["w4"][:, :, 0, 0] * sf[:, None],
        sf=col(sf), bf=col(bf), af=col(raw["af"]),
        _raw=raw,
    )


# ----------------------------------------------------------------------------
# Pure-JAX reference (NCHW, lax convs) for correctness checking
# ----------------------------------------------------------------------------
def reference_forward(x, raw):
    eps, d = raw["eps"], raw["d"]

    def bn(v, p):
        s = p["gamma"] / jnp.sqrt(p["var"] + eps)
        b = p["beta"] - p["mean"] * s
        return v * s[None, :, None, None] + b[None, :, None, None]

    def prelu(v, a):
        return jnp.where(v > 0, v, a[None, :, None, None] * v)

    def conv(v, w, pad, dil=1, groups=1):
        return jax.lax.conv_general_dilated(
            v, w, window_strides=(1, 1), padding=((pad, pad), (pad, pad)),
            rhs_dilation=(dil, dil), feature_group_count=groups,
            dimension_numbers=("NCHW", "OIHW", "NCHW"))

    y = prelu(bn(conv(x, raw["w1"], 1), raw["bn1"]), raw["a1"])
    c1 = round(y.shape[1] * 0.5)
    xl, xr = y[:, :c1], y[:, c1:]
    left = prelu(bn(conv(xl, raw["dwl"], 1, groups=xl.shape[1]), raw["bnl"]),
                 raw["al"])
    right = prelu(bn(conv(xr, raw["dwr"], d, dil=d, groups=xr.shape[1]),
                     raw["bnr"]), raw["ar"])
    u = jnp.concatenate([left, right], axis=1)
    r = prelu(bn(conv(u, raw["w3"], 1), raw["bn3"]), raw["a3"])
    z = conv(r, raw["w4"], 0)
    return prelu(bn(z + x, raw["bnf"]), raw["af"])


if __name__ == "__main__":
    key = jax.random.PRNGKey(0)
    B, C, H, W = 2, 16, 16, 16            # nIn = 16 -> C/2 = 8, C/4 = 4
    kx, kp1, kp2 = jax.random.split(key, 3)
    x = jax.random.normal(kx, (B, C, H, W), jnp.float32)

    for d, kp in ((1, kp1), (2, kp2)):     # exercise plain + dilated paths
        params = init_params(kp, C, d=d)
        out = jax.block_until_ready(sem_b_forward(x, params, d=d))
        ref = reference_forward(x, params["_raw"])
        assert out.shape == (B, C, H, W)
        max_err = float(jnp.max(jnp.abs(out - ref)))
        assert jnp.allclose(out, ref, rtol=1e-3, atol=1e-3), \
            f"d={d} max_err={max_err}"

    print("KERNEL_OK")
</pallas_src>

<mosaic_0001>
module attributes {stable_mosaic.version = 11 : i64} {
  func.func @_sem_b_kernel(%arg0: i32, %arg1: memref<1x16x256xf32, #tpu.memory_space<vmem>>, %arg2: memref<9x8x16xf32, #tpu.memory_space<vmem>>, %arg3: memref<8x1xf32, #tpu.memory_space<vmem>>, %arg4: memref<8x1xf32, #tpu.memory_space<vmem>>, %arg5: memref<9x4x1xf32, #tpu.memory_space<vmem>>, %arg6: memref<4x1xf32, #tpu.memory_space<vmem>>, %arg7: memref<4x1xf32, #tpu.memory_space<vmem>>, %arg8: memref<9x4x1xf32, #tpu.memory_space<vmem>>, %arg9: memref<4x1xf32, #tpu.memory_space<vmem>>, %arg10: memref<4x1xf32, #tpu.memory_space<vmem>>, %arg11: memref<9x8x8xf32, #tpu.memory_space<vmem>>, %arg12: memref<8x1xf32, #tpu.memory_space<vmem>>, %arg13: memref<8x1xf32, #tpu.memory_space<vmem>>, %arg14: memref<16x8xf32, #tpu.memory_space<vmem>>, %arg15: memref<16x1xf32, #tpu.memory_space<vmem>>, %arg16: memref<16x1xf32, #tpu.memory_space<vmem>>, %arg17: memref<16x1xf32, #tpu.memory_space<vmem>>, %arg18: memref<1x16x256xf32, #tpu.memory_space<vmem>>, %arg19: memref<16x512xf32, #tpu.memory_space<vmem>>) attributes {dimension_semantics = [#tpu.dimension_semantics<parallel>], iteration_bounds = array<i64: 2>, scalar_prefetch = 0 : i64, scratch_operands = 1 : i64, tpu.core_type = #tpu.core_type<tc>, window_params = [{transform_indices = @transform_0, window_bounds = array<i64: 1, 16, 256>}, {pipeline_mode = #tpu.pipeline_mode<synchronous>, transform_indices = @transform_1, window_bounds = array<i64: 9, 8, 16>}, {pipeline_mode = #tpu.pipeline_mode<synchronous>, transform_indices = @transform_2, window_bounds = array<i64: 8, 1>}, {pipeline_mode = #tpu.pipeline_mode<synchronous>, transform_indices = @transform_3, window_bounds = array<i64: 8, 1>}, {pipeline_mode = #tpu.pipeline_mode<synchronous>, transform_indices = @transform_4, window_bounds = array<i64: 9, 4, 1>}, {pipeline_mode = #tpu.pipeline_mode<synchronous>, transform_indices = @transform_5, window_bounds = array<i64: 4, 1>}, {pipeline_mode = #tpu.pipeline_mode<synchronous>, transform_indices = @transform_6, window_bounds = array<i64: 4, 1>}, {pipeline_mode = #tpu.pipeline_mode<synchronous>, transform_indices = @transform_7, window_bounds = array<i64: 9, 4, 1>}, {pipeline_mode = #tpu.pipeline_mode<synchronous>, transform_indices = @transform_8, window_bounds = array<i64: 4, 1>}, {pipeline_mode = #tpu.pipeline_mode<synchronous>, transform_indices = @transform_9, window_bounds = array<i64: 4, 1>}, {pipeline_mode = #tpu.pipeline_mode<synchronous>, transform_indices = @transform_10, window_bounds = array<i64: 9, 8, 8>}, {pipeline_mode = #tpu.pipeline_mode<synchronous>, transform_indices = @transform_11, window_bounds = array<i64: 8, 1>}, {pipeline_mode = #tpu.pipeline_mode<synchronous>, transform_indices = @transform_12, window_bounds = array<i64: 8, 1>}, {pipeline_mode = #tpu.pipeline_mode<synchronous>, transform_indices = @transform_13, window_bounds = array<i64: 16, 8>}, {pipeline_mode = #tpu.pipeline_mode<synchronous>, transform_indices = @transform_14, window_bounds = array<i64: 16, 1>}, {pipeline_mode = #tpu.pipeline_mode<synchronous>, transform_indices = @transform_15, window_bounds = array<i64: 16, 1>}, {pipeline_mode = #tpu.pipeline_mode<synchronous>, transform_indices = @transform_16, window_bounds = array<i64: 16, 1>}, {transform_indices = @transform_17, window_bounds = array<i64: 1, 16, 256>}]} {
    %0 = tpu.iota {dimensions = array<i32: 1>} : vector<1x256xi32>
    %c16_i32 = arith.constant 16 : i32
    %c0_i32 = arith.constant 0 : i32
    %1 = arith.cmpi eq, %c16_i32, %c0_i32 : i32
    %c1_i32 = arith.constant 1 : i32
    %2 = arith.select %1, %c1_i32, %c16_i32 : i32
    %3 = vector.broadcast %2 : i32 to vector<1x256xi32>
    %4 = arith.remsi %0, %3 : vector<1x256xi32>
    %c0_i32_0 = arith.constant 0 : i32
    %5 = vector.broadcast %c0_i32_0 : i32 to vector<1x256xi32>
    %6 = arith.cmpi ne, %4, %5 : vector<1x256xi32>
    %c0_i32_1 = arith.constant 0 : i32
    %7 = vector.broadcast %c0_i32_1 : i32 to vector<1x256xi32>
    %8 = arith.cmpi slt, %4, %7 : vector<1x256xi32>
    %c0_i32_2 = arith.constant 0 : i32
    %9 = arith.cmpi slt, %2, %c0_i32_2 : i32
    %10 = vector.broadcast %9 : i1 to vector<1x256xi1>
    %11 = vector.broadcast %10 : vector<1x256xi1> to vector<1x256xi1>
    %12 = arith.xori %8, %11 : vector<1x256xi1>
    %13 = arith.andi %12, %6 : vector<1x256xi1>
    %14 = vector.broadcast %2 : i32 to vector<1x256xi32>
    %15 = arith.addi %4, %14 : vector<1x256xi32>
    %16 = arith.select %13, %15, %4 : vector<1x256xi1>, vector<1x256xi32>
    %c1_i32_3 = arith.constant 1 : i32
    %17 = vector.broadcast %c1_i32_3 : i32 to vector<1x256xi32>
    %18 = arith.cmpi sge, %16, %17 : vector<1x256xi32>
    %c15_i32 = arith.constant 15 : i32
    %19 = vector.broadcast %c15_i32 : i32 to vector<1x256xi32>
    %20 = arith.cmpi slt, %16, %19 : vector<1x256xi32>
    %cst = arith.constant 0.000000e+00 : f32
    %21 = vector.broadcast %cst : f32 to vector<16x128xf32>
    %c0 = arith.constant 0 : index
    %c0_4 = arith.constant 0 : index
    %22 = vector.load %arg19[%c0, %c0_4] : memref<16x512xf32, #tpu.memory_space<vmem>>, vector<16x128xf32>
    tpu.vector_store %arg19[%c0, %c0_4], %21 {strides = array<i32>} : memref<16x512xf32, #tpu.memory_space<vmem>>, vector<16x128xf32>,
    %cst_5 = arith.constant 0.000000e+00 : f32
    %23 = vector.broadcast %cst_5 : f32 to vector<16x128xf32>
    %c0_6 = arith.constant 0 : index
    %c384 = arith.constant 384 : index
    %24 = vector.load %arg19[%c0_6, %c384] : memref<16x512xf32, #tpu.memory_space<vmem>>, vector<16x128xf32>
    tpu.vector_store %arg19[%c0_6, %c384], %23 {strides = array<i32>} : memref<16x512xf32, #tpu.memory_space<vmem>>, vector<16x128xf32>,
    %c0_7 = arith.constant 0 : index
    %c0_8 = arith.constant 0 : index
    %c0_9 = arith.constant 0 : index
    %25 = vector.load %arg1[%c0_7, %c0_8, %c0_9] : memref<1x16x256xf32, #tpu.memory_space<vmem>>, vector<1x16x256xf32>
    %26 = vector.shape_cast %25 : vector<1x16x256xf32> to vector<16x256xf32>
    %c0_10 = arith.constant 0 : index
    %c128 = arith.constant 128 : index
    %27 = vector.load %arg19[%c0_10, %c128] : memref<16x512xf32, #tpu.memory_space<vmem>>, vector<16x256xf32>
    tpu.vector_store %arg19[%c0_10, %c128], %26 {strides = array<i32>} : memref<16x512xf32, #tpu.memory_space<vmem>>, vector<16x256xf32>,
    %c0_11 = arith.constant 0 : index
    %c0_12 = arith.constant 0 : index
    %28 = vector.load %arg3[%c0_11, %c0_12] : memref<8x1xf32, #tpu.memory_space<vmem>>, vector<8x1xf32>
    %29 = vector.shape_cast %28 : vector<8x1xf32> to vector<8x1xf32>
    %30 = vector.broadcast %29 : vector<8x1xf32> to vector<8x256xf32>
    %c0_13 = arith.constant 0 : index
    %c0_14 = arith.constant 0 : index
    %c0_15 = arith.constant 0 : index
    %31 = vector.load %arg2[%c0_13, %c0_14, %c0_15] : memref<9x8x16xf32, #tpu.memory_space<vmem>>, vector<1x8x16xf32>
    %32 = vector.shape_cast %31 : vector<1x8x16xf32> to vector<8x16xf32>
    %c0_16 = arith.constant 0 : index
    %c111 = arith.constant 111 : index
    %33 = vector.load %arg19[%c0_16, %c111] : memref<16x512xf32, #tpu.memory_space<vmem>>, vector<16x256xf32>
    %cst_17 = arith.constant 0.000000e+00 : f32
    %34 = vector.shape_cast %18 : vector<1x256xi1> to vector<1x256xi1>
    %35 = vector.broadcast %34 : vector<1x256xi1> to vector<16x256xi1>
    %36 = vector.broadcast %cst_17 : f32 to vector<16x256xf32>
    %37 = arith.select %35, %33, %36 : vector<16x256xi1>, vector<16x256xf32>
    %cst_18 = arith.constant dense<0.000000e+00> : vector<8x256xf32>
    %38 = tpu.matmul %32, %37, %cst_18 {dimension_numbers = #tpu.dot_dimension_numbers<[1], [0], [0], [1], [0, 0, 1, 1], [], []>} : vector<8x16xf32>, vector<16x256xf32>, vector<8x256xf32> -> vector<8x256xf32>
    %39 = arith.addf %30, %38 : vector<8x256xf32>
    %c1 = arith.constant 1 : index
    %c0_19 = arith.constant 0 : index
    %c0_20 = arith.constant 0 : index
    %40 = vector.load %arg2[%c1, %c0_19, %c0_20] : memref<9x8x16xf32, #tpu.memory_space<vmem>>, vector<1x8x16xf32>
    %41 = vector.shape_cast %40 : vector<1x8x16xf32> to vector<8x16xf32>
    %c0_21 = arith.constant 0 : index
    %c112 = arith.constant 112 : index
    %42 = vector.load %arg19[%c0_21, %c112] : memref<16x512xf32, #tpu.memory_space<vmem>>, vector<16x256xf32>
    %cst_22 = arith.constant dense<0.000000e+00> : vector<8x256xf32>
    %43 = tpu.matmul %41, %42, %cst_22 {dimension_numbers = #tpu.dot_dimension_numbers<[1], [0], [0], [1], [0, 0, 1, 1], [], []>} : vector<8x16xf32>, vector<16x256xf32>, vector<8x256xf32> -> vector<8x256xf32>
    %44 = arith.addf %39, %43 : vector<8x256xf32>
    %c2 = arith.constant 2 : index
    %c0_23 = arith.constant 0 : index
    %c0_24 = arith.constant 0 : index
    %45 = vector.load %arg2[%c2, %c0_23, %c0_24] : memref<9x8x16xf32, #tpu.memory_space<vmem>>, vector<1x8x16xf32>
    %46 = vector.shape_cast %45 : vector<1x8x16xf32> to vector<8x16xf32>
    %c0_25 = arith.constant 0 : index
    %c113 = arith.constant 113 : index
    %47 = vector.load %arg19[%c0_25, %c113] : memref<16x512xf32, #tpu.memory_space<vmem>>, vector<16x256xf32>
    %cst_26 = arith.constant 0.000000e+00 : f32
    %48 = vector.shape_cast %20 : vector<1x256xi1> to vector<1x256xi1>
    %49 = vector.broadcast %48 : vector<1x256xi1> to vector<16x256xi1>
    %50 = vector.broadcast %cst_26 : f32 to vector<16x256xf32>
    %51 = arith.select %49, %47, %50 : vector<16x256xi1>, vector<16x256xf32>
    %cst_27 = arith.constant dense<0.000000e+00> : vector<8x256xf32>
    %52 = tpu.matmul %46, %51, %cst_27 {dimension_numbers = #tpu.dot_dimension_numbers<[1], [0], [0], [1], [0, 0, 1, 1], [], []>} : vector<8x16xf32>, vector<16x256xf32>, vector<8x256xf32> -> vector<8x256xf32>
    %53 = arith.addf %44, %52 : vector<8x256xf32>
    %c3 = arith.constant 3 : index
    %c0_28 = arith.constant 0 : index
    %c0_29 = arith.constant 0 : index
    %54 = vector.load %arg2[%c3, %c0_28, %c0_29] : memref<9x8x16xf32, #tpu.memory_space<vmem>>, vector<1x8x16xf32>
    %55 = vector.shape_cast %54 : vector<1x8x16xf32> to vector<8x16xf32>
    %c0_30 = arith.constant 0 : index
    %c127 = arith.constant 127 : index
    %56 = vector.load %arg19[%c0_30, %c127] : memref<16x512xf32, #tpu.memory_space<vmem>>, vector<16x256xf32>
    %cst_31 = arith.constant 0.000000e+00 : f32
    %57 = vector.shape_cast %18 : vector<1x256xi1> to vector<1x256xi1>
    %58 = vector.broadcast %57 : vector<1x256xi1> to vector<16x256xi1>
    %59 = vector.broadcast %cst_31 : f32 to vector<16x256xf32>
    %60 = arith.select %58, %56, %59 : vector<16x256xi1>, vector<16x256xf32>
    %cst_32 = arith.constant dense<0.000000e+00> : vector<8x256xf32>
    %61 = tpu.matmul %55, %60, %cst_32 {dimension_numbers = #tpu.dot_dimension_numbers<[1], [0], [0], [1], [0, 0, 1, 1], [], []>} : vector<8x16xf32>, vector<16x256xf32>, vector<8x256xf32> -> vector<8x256xf32>
    %62 = arith.addf %53, %61 : vector<8x256xf32>
    %c4 = arith.constant 4 : index
    %c0_33 = arith.constant 0 : index
    %c0_34 = arith.constant 0 : index
    %63 = vector.load %arg2[%c4, %c0_33, %c0_34] : memref<9x8x16xf32, #tpu.memory_space<vmem>>, vector<1x8x16xf32>
    %64 = vector.shape_cast %63 : vector<1x8x16xf32> to vector<8x16xf32>
    %c0_35 = arith.constant 0 : index
    %c128_36 = arith.constant 128 : index
    %65 = vector.load %arg19[%c0_35, %c128_36] : memref<16x512xf32, #tpu.memory_space<vmem>>, vector<16x256xf32>
    %cst_37 = arith.constant dense<0.000000e+00> : vector<8x256xf32>
    %66 = tpu.matmul %64, %65, %cst_37 {dimension_numbers = #tpu.dot_dimension_numbers<[1], [0], [0], [1], [0, 0, 1, 1], [], []>} : vector<8x16xf32>, vector<16x256xf32>, vector<8x256xf32> -> vector<8x256xf32>
    %67 = arith.addf %62, %66 : vector<8x256xf32>
    %c5 = arith.constant 5 : index
    %c0_38 = arith.constant 0 : index
    %c0_39 = arith.constant 0 : index
    %68 = vector.load %arg2[%c5, %c0_38, %c0_39] : memref<9x8x16xf32, #tpu.memory_space<vmem>>, vector<1x8x16xf32>
    %69 = vector.shape_cast %68 : vector<1x8x16xf32> to vector<8x16xf32>
    %c0_40 = arith.constant 0 : index
    %c129 = arith.constant 129 : index
    %70 = vector.load %arg19[%c0_40, %c129] : memref<16x512xf32, #tpu.memory_space<vmem>>, vector<16x256xf32>
    %cst_41 = arith.constant 0.000000e+00 : f32
    %71 = vector.shape_cast %20 : vector<1x256xi1> to vector<1x256xi1>
    %72 = vector.broadcast %71 : vector<1x256xi1> to vector<16x256xi1>
    %73 = vector.broadcast %cst_41 : f32 to vector<16x256xf32>
    %74 = arith.select %72, %70, %73 : vector<16x256xi1>, vector<16x256xf32>
    %cst_42 = arith.constant dense<0.000000e+00> : vector<8x256xf32>
    %75 = tpu.matmul %69, %74, %cst_42 {dimension_numbers = #tpu.dot_dimension_numbers<[1], [0], [0], [1], [0, 0, 1, 1], [], []>} : vector<8x16xf32>, vector<16x256xf32>, vector<8x256xf32> -> vector<8x256xf32>
    %76 = arith.addf %67, %75 : vector<8x256xf32>
    %c6 = arith.constant 6 : index
    %c0_43 = arith.constant 0 : index
    %c0_44 = arith.constant 0 : index
    %77 = vector.load %arg2[%c6, %c0_43, %c0_44] : memref<9x8x16xf32, #tpu.memory_space<vmem>>, vector<1x8x16xf32>
    %78 = vector.shape_cast %77 : vector<1x8x16xf32> to vector<8x16xf32>
    %c0_45 = arith.constant 0 : index
    %c143 = arith.constant 143 : index
    %79 = vector.load %arg19[%c0_45, %c143] : memref<16x512xf32, #tpu.memory_space<vmem>>, vector<16x256xf32>
    %cst_46 = arith.constant 0.000000e+00 : f32
    %80 = vector.shape_cast %18 : vector<1x256xi1> to vector<1x256xi1>
    %81 = vector.broadcast %80 : vector<1x256xi1> to vector<16x256xi1>
    %82 = vector.broadcast %cst_46 : f32 to vector<16x256xf32>
    %83 = arith.select %81, %79, %82 : vector<16x256xi1>, vector<16x256xf32>
    %cst_47 = arith.constant dense<0.000000e+00> : vector<8x256xf32>
    %84 = tpu.matmul %78, %83, %cst_47 {dimension_numbers = #tpu.dot_dimension_numbers<[1], [0], [0], [1], [0, 0, 1, 1], [], []>} : vector<8x16xf32>, vector<16x256xf32>, vector<8x256xf32> -> vector<8x256xf32>
    %85 = arith.addf %76, %84 : vector<8x256xf32>
    %c7 = arith.constant 7 : index
    %c0_48 = arith.constant 0 : index
    %c0_49 = arith.constant 0 : index
    %86 = vector.load %arg2[%c7, %c0_48, %c0_49] : memref<9x8x16xf32, #tpu.memory_space<vmem>>, vector<1x8x16xf32>
    %87 = vector.shape_cast %86 : vector<1x8x16xf32> to vector<8x16xf32>
    %c0_50 = arith.constant 0 : index
    %c144 = arith.constant 144 : index
    %88 = vector.load %arg19[%c0_50, %c144] : memref<16x512xf32, #tpu.memory_space<vmem>>, vector<16x256xf32>
    %cst_51 = arith.constant dense<0.000000e+00> : vector<8x256xf32>
    %89 = tpu.matmul %87, %88, %cst_51 {dimension_numbers = #tpu.dot_dimension_numbers<[1], [0], [0], [1], [0, 0, 1, 1], [], []>} : vector<8x16xf32>, vector<16x256xf32>, vector<8x256xf32> -> vector<8x256xf32>
    %90 = arith.addf %85, %89 : vector<8x256xf32>
    %c8 = arith.constant 8 : index
    %c0_52 = arith.constant 0 : index
    %c0_53 = arith.constant 0 : index
    %91 = vector.load %arg2[%c8, %c0_52, %c0_53] : memref<9x8x16xf32, #tpu.memory_space<vmem>>, vector<1x8x16xf32>
    %92 = vector.shape_cast %91 : vector<1x8x16xf32> to vector<8x16xf32>
    %c0_54 = arith.constant 0 : index
    %c145 = arith.constant 145 : index
    %93 = vector.load %arg19[%c0_54, %c145] : memref<16x512xf32, #tpu.memory_space<vmem>>, vector<16x256xf32>
    %cst_55 = arith.constant 0.000000e+00 : f32
    %94 = vector.shape_cast %20 : vector<1x256xi1> to vector<1x256xi1>
    %95 = vector.broadcast %94 : vector<1x256xi1> to vector<16x256xi1>
    %96 = vector.broadcast %cst_55 : f32 to vector<16x256xf32>
    %97 = arith.select %95, %93, %96 : vector<16x256xi1>, vector<16x256xf32>
    %cst_56 = arith.constant dense<0.000000e+00> : vector<8x256xf32>
    %98 = tpu.matmul %92, %97, %cst_56 {dimension_numbers = #tpu.dot_dimension_numbers<[1], [0], [0], [1], [0, 0, 1, 1], [], []>} : vector<8x16xf32>, vector<16x256xf32>, vector<8x256xf32> -> vector<8x256xf32>
    %99 = arith.addf %90, %98 : vector<8x256xf32>
    %c0_57 = arith.constant 0 : index
    %c0_58 = arith.constant 0 : index
    %100 = vector.load %arg4[%c0_57, %c0_58] : memref<8x1xf32, #tpu.memory_space<vmem>>, vector<8x1xf32>
    %cst_59 = arith.constant 0.000000e+00 : f32
    %101 = vector.broadcast %cst_59 : f32 to vector<8x256xf32>
    %102 = arith.cmpf ogt, %99, %101 : vector<8x256xf32>
    %103 = vector.broadcast %100 : vector<8x1xf32> to vector<8x256xf32>
    %104 = arith.mulf %103, %99 : vector<8x256xf32>
    %105 = arith.select %102, %99, %104 : vector<8x256xi1>, vector<8x256xf32>
    %c0_60 = arith.constant 0 : index
    %c128_61 = arith.constant 128 : index
    %106 = vector.load %arg19[%c0_60, %c128_61] : memref<16x512xf32, #tpu.memory_space<vmem>>, vector<8x256xf32>
    tpu.vector_store %arg19[%c0_60, %c128_61], %105 {strides = array<i32>} : memref<16x512xf32, #tpu.memory_space<vmem>>, vector<8x256xf32>,
    %c0_62 = arith.constant 0 : index
    %c0_63 = arith.constant 0 : index
    %107 = vector.load %arg6[%c0_62, %c0_63] : memref<4x1xf32, #tpu.memory_space<vmem>>, vector<4x1xf32>
    %108 = vector.shape_cast %107 : vector<4x1xf32> to vector<4x1xf32>
    %109 = vector.broadcast %108 : vector<4x1xf32> to vector<4x256xf32>
    %c0_64 = arith.constant 0 : index
    %c0_65 = arith.constant 0 : index
    %110 = vector.load %arg9[%c0_64, %c0_65] : memref<4x1xf32, #tpu.memory_space<vmem>>, vector<4x1xf32>
    %111 = vector.shape_cast %110 : vector<4x1xf32> to vector<4x1xf32>
    %112 = vector.broadcast %111 : vector<4x1xf32> to vector<4x256xf32>
    %c0_66 = arith.constant 0 : index
    %c0_67 = arith.constant 0 : index
    %c0_68 = arith.constant 0 : index
    %113 = vector.load %arg5[%c0_66, %c0_67, %c0_68] : memref<9x4x1xf32, #tpu.memory_space<vmem>>, vector<1x4x1xf32>
    %114 = vector.shape_cast %113 : vector<1x4x1xf32> to vector<4x1xf32>
    %c0_69 = arith.constant 0 : index
    %c111_70 = arith.constant 111 : index
    %115 = vector.load %arg19[%c0_69, %c111_70] : memref<16x512xf32, #tpu.memory_space<vmem>>, vector<4x256xf32>
    %cst_71 = arith.constant 0.000000e+00 : f32
    %116 = vector.shape_cast %18 : vector<1x256xi1> to vector<1x256xi1>
    %117 = vector.broadcast %116 : vector<1x256xi1> to vector<4x256xi1>
    %118 = vector.broadcast %cst_71 : f32 to vector<4x256xf32>
    %119 = arith.select %117, %115, %118 : vector<4x256xi1>, vector<4x256xf32>
    %120 = vector.broadcast %114 : vector<4x1xf32> to vector<4x256xf32>
    %121 = arith.mulf %120, %119 : vector<4x256xf32>
    %122 = arith.addf %109, %121 : vector<4x256xf32>
    %c0_72 = arith.constant 0 : index
    %c0_73 = arith.constant 0 : index
    %c0_74 = arith.constant 0 : index
    %123 = vector.load %arg8[%c0_72, %c0_73, %c0_74] : memref<9x4x1xf32, #tpu.memory_space<vmem>>, vector<1x4x1xf32>
    %124 = vector.shape_cast %123 : vector<1x4x1xf32> to vector<4x1xf32>
    %c4_75 = arith.constant 4 : index
    %c111_76 = arith.constant 111 : index
    %125 = vector.load %arg19[%c4_75, %c111_76] : memref<16x512xf32, #tpu.memory_space<vmem>>, vector<4x256xf32>
    %cst_77 = arith.constant 0.000000e+00 : f32
    %126 = vector.shape_cast %18 : vector<1x256xi1> to vector<1x256xi1>
    %127 = vector.broadcast %126 : vector<1x256xi1> to vector<4x256xi1>
    %128 = vector.broadcast %cst_77 : f32 to vector<4x256xf32>
    %129 = arith.select %127, %125, %128 : vector<4x256xi1>, vector<4x256xf32>
    %130 = vector.broadcast %124 : vector<4x1xf32> to vector<4x256xf32>
    %131 = arith.mulf %130, %129 : vector<4x256xf32>
    %132 = arith.addf %112, %131 : vector<4x256xf32>
    %c1_78 = arith.constant 1 : index
    %c0_79 = arith.constant 0 : index
    %c0_80 = arith.constant 0 : index
    %133 = vector.load %arg5[%c1_78, %c0_79, %c0_80] : memref<9x4x1xf32, #tpu.memory_space<vmem>>, vector<1x4x1xf32>
    %134 = vector.shape_cast %133 : vector<1x4x1xf32> to vector<4x1xf32>
    %c0_81 = arith.constant 0 : index
    %c112_82 = arith.constant 112 : index
    %135 = vector.load %arg19[%c0_81, %c112_82] : memref<16x512xf32, #tpu.memory_space<vmem>>, vector<4x256xf32>
    %136 = vector.broadcast %134 : vector<4x1xf32> to vector<4x256xf32>
    %137 = arith.mulf %136, %135 : vector<4x256xf32>
    %138 = arith.addf %122, %137 : vector<4x256xf32>
    %c1_83 = arith.constant 1 : index
    %c0_84 = arith.constant 0 : index
    %c0_85 = arith.constant 0 : index
    %139 = vector.load %arg8[%c1_83, %c0_84, %c0_85] : memref<9x4x1xf32, #tpu.memory_space<vmem>>, vector<1x4x1xf32>
    %140 = vector.shape_cast %139 : vector<1x4x1xf32> to vector<4x1xf32>
    %c4_86 = arith.constant 4 : index
    %c112_87 = arith.constant 112 : index
    %141 = vector.load %arg19[%c4_86, %c112_87] : memref<16x512xf32, #tpu.memory_space<vmem>>, vector<4x256xf32>
    %142 = vector.broadcast %140 : vector<4x1xf32> to vector<4x256xf32>
    %143 = arith.mulf %142, %141 : vector<4x256xf32>
    %144 = arith.addf %132, %143 : vector<4x256xf32>
    %c2_88 = arith.constant 2 : index
    %c0_89 = arith.constant 0 : index
    %c0_90 = arith.constant 0 : index
    %145 = vector.load %arg5[%c2_88, %c0_89, %c0_90] : memref<9x4x1xf32, #tpu.memory_space<vmem>>, vector<1x4x1xf32>
    %146 = vector.shape_cast %145 : vector<1x4x1xf32> to vector<4x1xf32>
    %c0_91 = arith.constant 0 : index
    %c113_92 = arith.constant 113 : index
    %147 = vector.load %arg19[%c0_91, %c113_92] : memref<16x512xf32, #tpu.memory_space<vmem>>, vector<4x256xf32>
    %cst_93 = arith.constant 0.000000e+00 : f32
    %148 = vector.shape_cast %20 : vector<1x256xi1> to vector<1x256xi1>
    %149 = vector.broadcast %148 : vector<1x256xi1> to vector<4x256xi1>
    %150 = vector.broadcast %cst_93 : f32 to vector<4x256xf32>
    %151 = arith.select %149, %147, %150 : vector<4x256xi1>, vector<4x256xf32>
    %152 = vector.broadcast %146 : vector<4x1xf32> to vector<4x256xf32>
    %153 = arith.mulf %152, %151 : vector<4x256xf32>
    %154 = arith.addf %138, %153 : vector<4x256xf32>
    %c2_94 = arith.constant 2 : index
    %c0_95 = arith.constant 0 : index
    %c0_96 = arith.constant 0 : index
    %155 = vector.load %arg8[%c2_94, %c0_95, %c0_96] : memref<9x4x1xf32, #tpu.memory_space<vmem>>, vector<1x4x1xf32>
    %156 = vector.shape_cast %155 : vector<1x4x1xf32> to vector<4x1xf32>
    %c4_97 = arith.constant 4 : index
    %c113_98 = arith.constant 113 : index
    %157 = vector.load %arg19[%c4_97, %c113_98] : memref<16x512xf32, #tpu.memory_space<vmem>>, vector<4x256xf32>
    %cst_99 = arith.constant 0.000000e+00 : f32
    %158 = vector.shape_cast %20 : vector<1x256xi1> to vector<1x256xi1>
    %159 = vector.broadcast %158 : vector<1x256xi1> to vector<4x256xi1>
    %160 = vector.broadcast %cst_99 : f32 to vector<4x256xf32>
    %161 = arith.select %159, %157, %160 : vector<4x256xi1>, vector<4x256xf32>
    %162 = vector.broadcast %156 : vector<4x1xf32> to vector<4x256xf32>
    %163 = arith.mulf %162, %161 : vector<4x256xf32>
    %164 = arith.addf %144, %163 : vector<4x256xf32>
    %c3_100 = arith.constant 3 : index
    %c0_101 = arith.constant 0 : index
    %c0_102 = arith.constant 0 : index
    %165 = vector.load %arg5[%c3_100, %c0_101, %c0_102] : memref<9x4x1xf32, #tpu.memory_space<vmem>>, vector<1x4x1xf32>
    %166 = vector.shape_cast %165 : vector<1x4x1xf32> to vector<4x1xf32>
    %c0_103 = arith.constant 0 : index
    %c127_104 = arith.constant 127 : index
    %167 = vector.load %arg19[%c0_103, %c127_104] : memref<16x512xf32, #tpu.memory_space<vmem>>, vector<4x256xf32>
    %cst_105 = arith.constant 0.000000e+00 : f32
    %168 = vector.shape_cast %18 : vector<1x256xi1> to vector<1x256xi1>
    %169 = vector.broadcast %168 : vector<1x256xi1> to vector<4x256xi1>
    %170 = vector.broadcast %cst_105 : f32 to vector<4x256xf32>
    %171 = arith.select %169, %167, %170 : vector<4x256xi1>, vector<4x256xf32>
    %172 = vector.broadcast %166 : vector<4x1xf32> to vector<4x256xf32>
    %173 = arith.mulf %172, %171 : vector<4x256xf32>
    %174 = arith.addf %154, %173 : vector<4x256xf32>
    %c3_106 = arith.constant 3 : index
    %c0_107 = arith.constant 0 : index
    %c0_108 = arith.constant 0 : index
    %175 = vector.load %arg8[%c3_106, %c0_107, %c0_108] : memref<9x4x1xf32, #tpu.memory_space<vmem>>, vector<1x4x1xf32>
    %176 = vector.shape_cast %175 : vector<1x4x1xf32> to vector<4x1xf32>
    %c4_109 = arith.constant 4 : index
    %c127_110 = arith.constant 127 : index
    %177 = vector.load %arg19[%c4_109, %c127_110] : memref<16x512xf32, #tpu.memory_space<vmem>>, vector<4x256xf32>
    %cst_111 = arith.constant 0.000000e+00 : f32
    %178 = vector.shape_cast %18 : vector<1x256xi1> to vector<1x256xi1>
    %179 = vector.broadcast %178 : vector<1x256xi1> to vector<4x256xi1>
    %180 = vector.broadcast %cst_111 : f32 to vector<4x256xf32>
    %181 = arith.select %179, %177, %180 : vector<4x256xi1>, vector<4x256xf32>
    %182 = vector.broadcast %176 : vector<4x1xf32> to vector<4x256xf32>
    %183 = arith.mulf %182, %181 : vector<4x256xf32>
    %184 = arith.addf %164, %183 : vector<4x256xf32>
    %c4_112 = arith.constant 4 : index
    %c0_113 = arith.constant 0 : index
    %c0_114 = arith.constant 0 : index
    %185 = vector.load %arg5[%c4_112, %c0_113, %c0_114] : memref<9x4x1xf32, #tpu.memory_space<vmem>>, vector<1x4x1xf32>
    %186 = vector.shape_cast %185 : vector<1x4x1xf32> to vector<4x1xf32>
    %c0_115 = arith.constant 0 : index
    %c128_116 = arith.constant 128 : index
    %187 = vector.load %arg19[%c0_115, %c128_116] : memref<16x512xf32, #tpu.memory_space<vmem>>, vector<4x256xf32>
    %188 = vector.broadcast %186 : vector<4x1xf32> to vector<4x256xf32>
    %189 = arith.mulf %188, %187 : vector<4x256xf32>
    %190 = arith.addf %174, %189 : vector<4x256xf32>
    %c4_117 = arith.constant 4 : index
    %c0_118 = arith.constant 0 : index
    %c0_119 = arith.constant 0 : index
    %191 = vector.load %arg8[%c4_117, %c0_118, %c0_119] : memref<9x4x1xf32, #tpu.memory_space<vmem>>, vector<1x4x1xf32>
    %192 = vector.shape_cast %191 : vector<1x4x1xf32> to vector<4x1xf32>
    %c4_120 = arith.constant 4 : index
    %c128_121 = arith.constant 128 : index
    %193 = vector.load %arg19[%c4_120, %c128_121] : memref<16x512xf32, #tpu.memory_space<vmem>>, vector<4x256xf32>
    %194 = vector.broadcast %192 : vector<4x1xf32> to vector<4x256xf32>
    %195 = arith.mulf %194, %193 : vector<4x256xf32>
    %196 = arith.addf %184, %195 : vector<4x256xf32>
    %c5_122 = arith.constant 5 : index
    %c0_123 = arith.constant 0 : index
    %c0_124 = arith.constant 0 : index
    %197 = vector.load %arg5[%c5_122, %c0_123, %c0_124] : memref<9x4x1xf32, #tpu.memory_space<vmem>>, vector<1x4x1xf32>
    %198 = vector.shape_cast %197 : vector<1x4x1xf32> to vector<4x1xf32>
    %c0_125 = arith.constant 0 : index
    %c129_126 = arith.constant 129 : index
    %199 = vector.load %arg19[%c0_125, %c129_126] : memref<16x512xf32, #tpu.memory_space<vmem>>, vector<4x256xf32>
    %cst_127 = arith.constant 0.000000e+00 : f32
    %200 = vector.shape_cast %20 : vector<1x256xi1> to vector<1x256xi1>
    %201 = vector.broadcast %200 : vector<1x256xi1> to vector<4x256xi1>
    %202 = vector.broadcast %cst_127 : f32 to vector<4x256xf32>
    %203 = arith.select %201, %199, %202 : vector<4x256xi1>, vector<4x256xf32>
    %204 = vector.broadcast %198 : vector<4x1xf32> to vector<4x256xf32>
    %205 = arith.mulf %204, %203 : vector<4x256xf32>
    %206 = arith.addf %190, %205 : vector<4x256xf32>
    %c5_128 = arith.constant 5 : index
    %c0_129 = arith.constant 0 : index
    %c0_130 = arith.constant 0 : index
    %207 = vector.load %arg8[%c5_128, %c0_129, %c0_130] : memref<9x4x1xf32, #tpu.memory_space<vmem>>, vector<1x4x1xf32>
    %208 = vector.shape_cast %207 : vector<1x4x1xf32> to vector<4x1xf32>
    %c4_131 = arith.constant 4 : index
    %c129_132 = arith.constant 129 : index
    %209 = vector.load %arg19[%c4_131, %c129_132] : memref<16x512xf32, #tpu.memory_space<vmem>>, vector<4x256xf32>
    %cst_133 = arith.constant 0.000000e+00 : f32
    %210 = vector.shape_cast %20 : vector<1x256xi1> to vector<1x256xi1>
    %211 = vector.broadcast %210 : vector<1x256xi1> to vector<4x256xi1>
    %212 = vector.broadcast %cst_133 : f32 to vector<4x256xf32>
    %213 = arith.select %211, %209, %212 : vector<4x256xi1>, vector<4x256xf32>
    %214 = vector.broadcast %208 : vector<4x1xf32> to vector<4x256xf32>
    %215 = arith.mulf %214, %213 : vector<4x256xf32>
    %216 = arith.addf %196, %215 : vector<4x256xf32>
    %c6_134 = arith.constant 6 : index
    %c0_135 = arith.constant 0 : index
    %c0_136 = arith.constant 0 : index
    %217 = vector.load %arg5[%c6_134, %c0_135, %c0_136] : memref<9x4x1xf32, #tpu.memory_space<vmem>>, vector<1x4x1xf32>
    %218 = vector.shape_cast %217 : vector<1x4x1xf32> to vector<4x1xf32>
    %c0_137 = arith.constant 0 : index
    %c143_138 = arith.constant 143 : index
    %219 = vector.load %arg19[%c0_137, %c143_138] : memref<16x512xf32, #tpu.memory_space<vmem>>, vector<4x256xf32>
    %cst_139 = arith.constant 0.000000e+00 : f32
    %220 = vector.shape_cast %18 : vector<1x256xi1> to vector<1x256xi1>
    %221 = vector.broadcast %220 : vector<1x256xi1> to vector<4x256xi1>
    %222 = vector.broadcast %cst_139 : f32 to vector<4x256xf32>
    %223 = arith.select %221, %219, %222 : vector<4x256xi1>, vector<4x256xf32>
    %224 = vector.broadcast %218 : vector<4x1xf32> to vector<4x256xf32>
    %225 = arith.mulf %224, %223 : vector<4x256xf32>
    %226 = arith.addf %206, %225 : vector<4x256xf32>
    %c6_140 = arith.constant 6 : index
    %c0_141 = arith.constant 0 : index
    %c0_142 = arith.constant 0 : index
    %227 = vector.load %arg8[%c6_140, %c0_141, %c0_142] : memref<9x4x1xf32, #tpu.memory_space<vmem>>, vector<1x4x1xf32>
    %228 = vector.shape_cast %227 : vector<1x4x1xf32> to vector<4x1xf32>
    %c4_143 = arith.constant 4 : index
    %c143_144 = arith.constant 143 : index
    %229 = vector.load %arg19[%c4_143, %c143_144] : memref<16x512xf32, #tpu.memory_space<vmem>>, vector<4x256xf32>
    %cst_145 = arith.constant 0.000000e+00 : f32
    %230 = vector.shape_cast %18 : vector<1x256xi1> to vector<1x256xi1>
    %231 = vector.broadcast %230 : vector<1x256xi1> to vector<4x256xi1>
    %232 = vector.broadcast %cst_145 : f32 to vector<4x256xf32>
    %233 = arith.select %231, %229, %232 : vector<4x256xi1>, vector<4x256xf32>
    %234 = vector.broadcast %228 : vector<4x1xf32> to vector<4x256xf32>
    %235 = arith.mulf %234, %233 : vector<4x256xf32>
    %236 = arith.addf %216, %235 : vector<4x256xf32>
    %c7_146 = arith.constant 7 : index
    %c0_147 = arith.constant 0 : index
    %c0_148 = arith.constant 0 : index
    %237 = vector.load %arg5[%c7_146, %c0_147, %c0_148] : memref<9x4x1xf32, #tpu.memory_space<vmem>>, vector<1x4x1xf32>
    %238 = vector.shape_cast %237 : vector<1x4x1xf32> to vector<4x1xf32>
    %c0_149 = arith.constant 0 : index
    %c144_150 = arith.constant 144 : index
    %239 = vector.load %arg19[%c0_149, %c144_150] : memref<16x512xf32, #tpu.memory_space<vmem>>, vector<4x256xf32>
    %240 = vector.broadcast %238 : vector<4x1xf32> to vector<4x256xf32>
    %241 = arith.mulf %240, %239 : vector<4x256xf32>
    %242 = arith.addf %226, %241 : vector<4x256xf32>
    %c7_151 = arith.constant 7 : index
    %c0_152 = arith.constant 0 : index
    %c0_153 = arith.constant 0 : index
    %243 = vector.load %arg8[%c7_151, %c0_152, %c0_153] : memref<9x4x1xf32, #tpu.memory_space<vmem>>, vector<1x4x1xf32>
    %244 = vector.shape_cast %243 : vector<1x4x1xf32> to vector<4x1xf32>
    %c4_154 = arith.constant 4 : index
    %c144_155 = arith.constant 144 : index
    %245 = vector.load %arg19[%c4_154, %c144_155] : memref<16x512xf32, #tpu.memory_space<vmem>>, vector<4x256xf32>
    %246 = vector.broadcast %244 : vector<4x1xf32> to vector<4x256xf32>
    %247 = arith.mulf %246, %245 : vector<4x256xf32>
    %248 = arith.addf %236, %247 : vector<4x256xf32>
    %c8_156 = arith.constant 8 : index
    %c0_157 = arith.constant 0 : index
    %c0_158 = arith.constant 0 : index
    %249 = vector.load %arg5[%c8_156, %c0_157, %c0_158] : memref<9x4x1xf32, #tpu.memory_space<vmem>>, vector<1x4x1xf32>
    %250 = vector.shape_cast %249 : vector<1x4x1xf32> to vector<4x1xf32>
    %c0_159 = arith.constant 0 : index
    %c145_160 = arith.constant 145 : index
    %251 = vector.load %arg19[%c0_159, %c145_160] : memref<16x512xf32, #tpu.memory_space<vmem>>, vector<4x256xf32>
    %cst_161 = arith.constant 0.000000e+00 : f32
    %252 = vector.shape_cast %20 : vector<1x256xi1> to vector<1x256xi1>
    %253 = vector.broadcast %252 : vector<1x256xi1> to vector<4x256xi1>
    %254 = vector.broadcast %cst_161 : f32 to vector<4x256xf32>
    %255 = arith.select %253, %251, %254 : vector<4x256xi1>, vector<4x256xf32>
    %256 = vector.broadcast %250 : vector<4x1xf32> to vector<4x256xf32>
    %257 = arith.mulf %256, %255 : vector<4x256xf32>
    %258 = arith.addf %242, %257 : vector<4x256xf32>
    %c8_162 = arith.constant 8 : index
    %c0_163 = arith.constant 0 : index
    %c0_164 = arith.constant 0 : index
    %259 = vector.load %arg8[%c8_162, %c0_163, %c0_164] : memref<9x4x1xf32, #tpu.memory_space<vmem>>, vector<1x4x1xf32>
    %260 = vector.shape_cast %259 : vector<1x4x1xf32> to vector<4x1xf32>
    %c4_165 = arith.constant 4 : index
    %c145_166 = arith.constant 145 : index
    %261 = vector.load %arg19[%c4_165, %c145_166] : memref<16x512xf32, #tpu.memory_space<vmem>>, vector<4x256xf32>
    %cst_167 = arith.constant 0.000000e+00 : f32
    %262 = vector.shape_cast %20 : vector<1x256xi1> to vector<1x256xi1>
    %263 = vector.broadcast %262 : vector<1x256xi1> to vector<4x256xi1>
    %264 = vector.broadcast %cst_167 : f32 to vector<4x256xf32>
    %265 = arith.select %263, %261, %264 : vector<4x256xi1>, vector<4x256xf32>
    %266 = vector.broadcast %260 : vector<4x1xf32> to vector<4x256xf32>
    %267 = arith.mulf %266, %265 : vector<4x256xf32>
    %268 = arith.addf %248, %267 : vector<4x256xf32>
    %c0_168 = arith.constant 0 : index
    %c0_169 = arith.constant 0 : index
    %269 = vector.load %arg7[%c0_168, %c0_169] : memref<4x1xf32, #tpu.memory_space<vmem>>, vector<4x1xf32>
    %cst_170 = arith.constant 0.000000e+00 : f32
    %270 = vector.broadcast %cst_170 : f32 to vector<4x256xf32>
    %271 = arith.cmpf ogt, %258, %270 : vector<4x256xf32>
    %272 = vector.broadcast %269 : vector<4x1xf32> to vector<4x256xf32>
    %273 = arith.mulf %272, %258 : vector<4x256xf32>
    %274 = arith.select %271, %258, %273 : vector<4x256xi1>, vector<4x256xf32>
    %c0_171 = arith.constant 0 : index
    %c0_172 = arith.constant 0 : index
    %275 = vector.load %arg10[%c0_171, %c0_172] : memref<4x1xf32, #tpu.memory_space<vmem>>, vector<4x1xf32>
    %cst_173 = arith.constant 0.000000e+00 : f32
    %276 = vector.broadcast %cst_173 : f32 to vector<4x256xf32>
    %277 = arith.cmpf ogt, %268, %276 : vector<4x256xf32>
    %278 = vector.broadcast %275 : vector<4x1xf32> to vector<4x256xf32>
    %279 = arith.mulf %278, %268 : vector<4x256xf32>
    %280 = arith.select %277, %268, %279 : vector<4x256xi1>, vector<4x256xf32>
    %c0_174 = arith.constant 0 : index
    %c128_175 = arith.constant 128 : index
    %281 = vector.load %arg19[%c0_174, %c128_175] : memref<16x512xf32, #tpu.memory_space<vmem>>, vector<4x256xf32>
    tpu.vector_store %arg19[%c0_174, %c128_175], %274 {strides = array<i32>} : memref<16x512xf32, #tpu.memory_space<vmem>>, vector<4x256xf32>,
    %c4_176 = arith.constant 4 : index
    %c128_177 = arith.constant 128 : index
    %282 = vector.load %arg19[%c4_176, %c128_177] : memref<16x512xf32, #tpu.memory_space<vmem>>, vector<4x256xf32>
    tpu.vector_store %arg19[%c4_176, %c128_177], %280 {strides = array<i32>} : memref<16x512xf32, #tpu.memory_space<vmem>>, vector<4x256xf32>,
    %c0_178 = arith.constant 0 : index
    %c0_179 = arith.constant 0 : index
    %283 = vector.load %arg12[%c0_178, %c0_179] : memref<8x1xf32, #tpu.memory_space<vmem>>, vector<8x1xf32>
    %284 = vector.shape_cast %283 : vector<8x1xf32> to vector<8x1xf32>
    %285 = vector.broadcast %284 : vector<8x1xf32> to vector<8x256xf32>
    %c0_180 = arith.constant 0 : index
    %c0_181 = arith.constant 0 : index
    %c0_182 = arith.constant 0 : index
    %286 = vector.load %arg11[%c0_180, %c0_181, %c0_182] : memref<9x8x8xf32, #tpu.memory_space<vmem>>, vector<1x8x8xf32>
    %287 = vector.shape_cast %286 : vector<1x8x8xf32> to vector<8x8xf32>
    %c0_183 = arith.constant 0 : index
    %c111_184 = arith.constant 111 : index
    %288 = vector.load %arg19[%c0_183, %c111_184] : memref<16x512xf32, #tpu.memory_space<vmem>>, vector<8x256xf32>
    %cst_185 = arith.constant 0.000000e+00 : f32
    %289 = vector.shape_cast %18 : vector<1x256xi1> to vector<1x256xi1>
    %290 = vector.broadcast %289 : vector<1x256xi1> to vector<8x256xi1>
    %291 = vector.broadcast %cst_185 : f32 to vector<8x256xf32>
    %292 = arith.select %290, %288, %291 : vector<8x256xi1>, vector<8x256xf32>
    %cst_186 = arith.constant dense<0.000000e+00> : vector<8x256xf32>
    %293 = tpu.matmul %287, %292, %cst_186 {dimension_numbers = #tpu.dot_dimension_numbers<[1], [0], [0], [1], [0, 0, 1, 1], [], []>} : vector<8x8xf32>, vector<8x256xf32>, vector<8x256xf32> -> vector<8x256xf32>
    %294 = arith.addf %285, %293 : vector<8x256xf32>
    %c1_187 = arith.constant 1 : index
    %c0_188 = arith.constant 0 : index
    %c0_189 = arith.constant 0 : index
    %295 = vector.load %arg11[%c1_187, %c0_188, %c0_189] : memref<9x8x8xf32, #tpu.memory_space<vmem>>, vector<1x8x8xf32>
    %296 = vector.shape_cast %295 : vector<1x8x8xf32> to vector<8x8xf32>
    %c0_190 = arith.constant 0 : index
    %c112_191 = arith.constant 112 : index
    %297 = vector.load %arg19[%c0_190, %c112_191] : memref<16x512xf32, #tpu.memory_space<vmem>>, vector<8x256xf32>
    %cst_192 = arith.constant dense<0.000000e+00> : vector<8x256xf32>
    %298 = tpu.matmul %296, %297, %cst_192 {dimension_numbers = #tpu.dot_dimension_numbers<[1], [0], [0], [1], [0, 0, 1, 1], [], []>} : vector<8x8xf32>, vector<8x256xf32>, vector<8x256xf32> -> vector<8x256xf32>
    %299 = arith.addf %294, %298 : vector<8x256xf32>
    %c2_193 = arith.constant 2 : index
    %c0_194 = arith.constant 0 : index
    %c0_195 = arith.constant 0 : index
    %300 = vector.load %arg11[%c2_193, %c0_194, %c0_195] : memref<9x8x8xf32, #tpu.memory_space<vmem>>, vector<1x8x8xf32>
    %301 = vector.shape_cast %300 : vector<1x8x8xf32> to vector<8x8xf32>
    %c0_196 = arith.constant 0 : index
    %c113_197 = arith.constant 113 : index
    %302 = vector.load %arg19[%c0_196, %c113_197] : memref<16x512xf32, #tpu.memory_space<vmem>>, vector<8x256xf32>
    %cst_198 = arith.constant 0.000000e+00 : f32
    %303 = vector.shape_cast %20 : vector<1x256xi1> to vector<1x256xi1>
    %304 = vector.broadcast %303 : vector<1x256xi1> to vector<8x256xi1>
    %305 = vector.broadcast %cst_198 : f32 to vector<8x256xf32>
    %306 = arith.select %304, %302, %305 : vector<8x256xi1>, vector<8x256xf32>
    %cst_199 = arith.constant dense<0.000000e+00> : vector<8x256xf32>
    %307 = tpu.matmul %301, %306, %cst_199 {dimension_numbers = #tpu.dot_dimension_numbers<[1], [0], [0], [1], [0, 0, 1, 1], [], []>} : vector<8x8xf32>, vector<8x256xf32>, vector<8x256xf32> -> vector<8x256xf32>
    %308 = arith.addf %299, %307 : vector<8x256xf32>
    %c3_200 = arith.constant 3 : index
    %c0_201 = arith.constant 0 : index
    %c0_202 = arith.constant 0 : index
    %309 = vector.load %arg11[%c3_200, %c0_201, %c0_202] : memref<9x8x8xf32, #tpu.memory_space<vmem>>, vector<1x8x8xf32>
    %310 = vector.shape_cast %309 : vector<1x8x8xf32> to vector<8x8xf32>
    %c0_203 = arith.constant 0 : index
    %c127_204 = arith.constant 127 : index
    %311 = vector.load %arg19[%c0_203, %c127_204] : memref<16x512xf32, #tpu.memory_space<vmem>>, vector<8x256xf32>
    %cst_205 = arith.constant 0.000000e+00 : f32
    %312 = vector.shape_cast %18 : vector<1x256xi1> to vector<1x256xi1>
    %313 = vector.broadcast %312 : vector<1x256xi1> to vector<8x256xi1>
    %314 = vector.broadcast %cst_205 : f32 to vector<8x256xf32>
    %315 = arith.select %313, %311, %314 : vector<8x256xi1>, vector<8x256xf32>
    %cst_206 = arith.constant dense<0.000000e+00> : vector<8x256xf32>
    %316 = tpu.matmul %310, %315, %cst_206 {dimension_numbers = #tpu.dot_dimension_numbers<[1], [0], [0], [1], [0, 0, 1, 1], [], []>} : vector<8x8xf32>, vector<8x256xf32>, vector<8x256xf32> -> vector<8x256xf32>
    %317 = arith.addf %308, %316 : vector<8x256xf32>
    %c4_207 = arith.constant 4 : index
    %c0_208 = arith.constant 0 : index
    %c0_209 = arith.constant 0 : index
    %318 = vector.load %arg11[%c4_207, %c0_208, %c0_209] : memref<9x8x8xf32, #tpu.memory_space<vmem>>, vector<1x8x8xf32>
    %319 = vector.shape_cast %318 : vector<1x8x8xf32> to vector<8x8xf32>
    %c0_210 = arith.constant 0 : index
    %c128_211 = arith.constant 128 : index
    %320 = vector.load %arg19[%c0_210, %c128_211] : memref<16x512xf32, #tpu.memory_space<vmem>>, vector<8x256xf32>
    %cst_212 = arith.constant dense<0.000000e+00> : vector<8x256xf32>
    %321 = tpu.matmul %319, %320, %cst_212 {dimension_numbers = #tpu.dot_dimension_numbers<[1], [0], [0], [1], [0, 0, 1, 1], [], []>} : vector<8x8xf32>, vector<8x256xf32>, vector<8x256xf32> -> vector<8x256xf32>
    %322 = arith.addf %317, %321 : vector<8x256xf32>
    %c5_213 = arith.constant 5 : index
    %c0_214 = arith.constant 0 : index
    %c0_215 = arith.constant 0 : index
    %323 = vector.load %arg11[%c5_213, %c0_214, %c0_215] : memref<9x8x8xf32, #tpu.memory_space<vmem>>, vector<1x8x8xf32>
    %324 = vector.shape_cast %323 : vector<1x8x8xf32> to vector<8x8xf32>
    %c0_216 = arith.constant 0 : index
    %c129_217 = arith.constant 129 : index
    %325 = vector.load %arg19[%c0_216, %c129_217] : memref<16x512xf32, #tpu.memory_space<vmem>>, vector<8x256xf32>
    %cst_218 = arith.constant 0.000000e+00 : f32
    %326 = vector.shape_cast %20 : vector<1x256xi1> to vector<1x256xi1>
    %327 = vector.broadcast %326 : vector<1x256xi1> to vector<8x256xi1>
    %328 = vector.broadcast %cst_218 : f32 to vector<8x256xf32>
    %329 = arith.select %327, %325, %328 : vector<8x256xi1>, vector<8x256xf32>
    %cst_219 = arith.constant dense<0.000000e+00> : vector<8x256xf32>
    %330 = tpu.matmul %324, %329, %cst_219 {dimension_numbers = #tpu.dot_dimension_numbers<[1], [0], [0], [1], [0, 0, 1, 1], [], []>} : vector<8x8xf32>, vector<8x256xf32>, vector<8x256xf32> -> vector<8x256xf32>
    %331 = arith.addf %322, %330 : vector<8x256xf32>
    %c6_220 = arith.constant 6 : index
    %c0_221 = arith.constant 0 : index
    %c0_222 = arith.constant 0 : index
    %332 = vector.load %arg11[%c6_220, %c0_221, %c0_222] : memref<9x8x8xf32, #tpu.memory_space<vmem>>, vector<1x8x8xf32>
    %333 = vector.shape_cast %332 : vector<1x8x8xf32> to vector<8x8xf32>
    %c0_223 = arith.constant 0 : index
    %c143_224 = arith.constant 143 : index
    %334 = vector.load %arg19[%c0_223, %c143_224] : memref<16x512xf32, #tpu.memory_space<vmem>>, vector<8x256xf32>
    %cst_225 = arith.constant 0.000000e+00 : f32
    %335 = vector.shape_cast %18 : vector<1x256xi1> to vector<1x256xi1>
    %336 = vector.broadcast %335 : vector<1x256xi1> to vector<8x256xi1>
    %337 = vector.broadcast %cst_225 : f32 to vector<8x256xf32>
    %338 = arith.select %336, %334, %337 : vector<8x256xi1>, vector<8x256xf32>
    %cst_226 = arith.constant dense<0.000000e+00> : vector<8x256xf32>
    %339 = tpu.matmul %333, %338, %cst_226 {dimension_numbers = #tpu.dot_dimension_numbers<[1], [0], [0], [1], [0, 0, 1, 1], [], []>} : vector<8x8xf32>, vector<8x256xf32>, vector<8x256xf32> -> vector<8x256xf32>
    %340 = arith.addf %331, %339 : vector<8x256xf32>
    %c7_227 = arith.constant 7 : index
    %c0_228 = arith.constant 0 : index
    %c0_229 = arith.constant 0 : index
    %341 = vector.load %arg11[%c7_227, %c0_228, %c0_229] : memref<9x8x8xf32, #tpu.memory_space<vmem>>, vector<1x8x8xf32>
    %342 = vector.shape_cast %341 : vector<1x8x8xf32> to vector<8x8xf32>
    %c0_230 = arith.constant 0 : index
    %c144_231 = arith.constant 144 : index
    %343 = vector.load %arg19[%c0_230, %c144_231] : memref<16x512xf32, #tpu.memory_space<vmem>>, vector<8x256xf32>
    %cst_232 = arith.constant dense<0.000000e+00> : vector<8x256xf32>
    %344 = tpu.matmul %342, %343, %cst_232 {dimension_numbers = #tpu.dot_dimension_numbers<[1], [0], [0], [1], [0, 0, 1, 1], [], []>} : vector<8x8xf32>, vector<8x256xf32>, vector<8x256xf32> -> vector<8x256xf32>
    %345 = arith.addf %340, %344 : vector<8x256xf32>
    %c8_233 = arith.constant 8 : index
    %c0_234 = arith.constant 0 : index
    %c0_235 = arith.constant 0 : index
    %346 = vector.load %arg11[%c8_233, %c0_234, %c0_235] : memref<9x8x8xf32, #tpu.memory_space<vmem>>, vector<1x8x8xf32>
    %347 = vector.shape_cast %346 : vector<1x8x8xf32> to vector<8x8xf32>
    %c0_236 = arith.constant 0 : index
    %c145_237 = arith.constant 145 : index
    %348 = vector.load %arg19[%c0_236, %c145_237] : memref<16x512xf32, #tpu.memory_space<vmem>>, vector<8x256xf32>
    %cst_238 = arith.constant 0.000000e+00 : f32
    %349 = vector.shape_cast %20 : vector<1x256xi1> to vector<1x256xi1>
    %350 = vector.broadcast %349 : vector<1x256xi1> to vector<8x256xi1>
    %351 = vector.broadcast %cst_238 : f32 to vector<8x256xf32>
    %352 = arith.select %350, %348, %351 : vector<8x256xi1>, vector<8x256xf32>
    %cst_239 = arith.constant dense<0.000000e+00> : vector<8x256xf32>
    %353 = tpu.matmul %347, %352, %cst_239 {dimension_numbers = #tpu.dot_dimension_numbers<[1], [0], [0], [1], [0, 0, 1, 1], [], []>} : vector<8x8xf32>, vector<8x256xf32>, vector<8x256xf32> -> vector<8x256xf32>
    %354 = arith.addf %345, %353 : vector<8x256xf32>
    %c0_240 = arith.constant 0 : index
    %c0_241 = arith.constant 0 : index
    %355 = vector.load %arg13[%c0_240, %c0_241] : memref<8x1xf32, #tpu.memory_space<vmem>>, vector<8x1xf32>
    %cst_242 = arith.constant 0.000000e+00 : f32
    %356 = vector.broadcast %cst_242 : f32 to vector<8x256xf32>
    %357 = arith.cmpf ogt, %354, %356 : vector<8x256xf32>
    %358 = vector.broadcast %355 : vector<8x1xf32> to vector<8x256xf32>
    %359 = arith.mulf %358, %354 : vector<8x256xf32>
    %360 = arith.select %357, %354, %359 : vector<8x256xi1>, vector<8x256xf32>
    %c0_243 = arith.constant 0 : index
    %c0_244 = arith.constant 0 : index
    %361 = vector.load %arg14[%c0_243, %c0_244] : memref<16x8xf32, #tpu.memory_space<vmem>>, vector<16x8xf32>
    %cst_245 = arith.constant dense<0.000000e+00> : vector<16x256xf32>
    %362 = tpu.matmul %361, %360, %cst_245 {dimension_numbers = #tpu.dot_dimension_numbers<[1], [0], [0], [1], [0, 0, 1, 1], [], []>} : vector<16x8xf32>, vector<8x256xf32>, vector<16x256xf32> -> vector<16x256xf32>
    %c0_246 = arith.constant 0 : index
    %c0_247 = arith.constant 0 : index
    %c0_248 = arith.constant 0 : index
    %363 = vector.load %arg1[%c0_246, %c0_247, %c0_248] : memref<1x16x256xf32, #tpu.memory_space<vmem>>, vector<1x16x256xf32>
    %364 = vector.shape_cast %363 : vector<1x16x256xf32> to vector<16x256xf32>
    %c0_249 = arith.constant 0 : index
    %c0_250 = arith.constant 0 : index
    %365 = vector.load %arg15[%c0_249, %c0_250] : memref<16x1xf32, #tpu.memory_space<vmem>>, vector<16x1xf32>
    %366 = vector.broadcast %365 : vector<16x1xf32> to vector<16x256xf32>
    %367 = arith.mulf %364, %366 : vector<16x256xf32>
    %368 = arith.addf %362, %367 : vector<16x256xf32>
    %c0_251 = arith.constant 0 : index
    %c0_252 = arith.constant 0 : index
    %369 = vector.load %arg16[%c0_251, %c0_252] : memref<16x1xf32, #tpu.memory_space<vmem>>, vector<16x1xf32>
    %370 = vector.broadcast %369 : vector<16x1xf32> to vector<16x256xf32>
    %371 = arith.addf %368, %370 : vector<16x256xf32>
    %c0_253 = arith.constant 0 : index
    %c0_254 = arith.constant 0 : index
    %372 = vector.load %arg17[%c0_253, %c0_254] : memref<16x1xf32, #tpu.memory_space<vmem>>, vector<16x1xf32>
    %cst_255 = arith.constant 0.000000e+00 : f32
    %373 = vector.broadcast %cst_255 : f32 to vector<16x256xf32>
    %374 = arith.cmpf ogt, %371, %373 : vector<16x256xf32>
    %375 = vector.broadcast %372 : vector<16x1xf32> to vector<16x256xf32>
    %376 = arith.mulf %375, %371 : vector<16x256xf32>
    %377 = arith.select %374, %371, %376 : vector<16x256xi1>, vector<16x256xf32>
    %c0_256 = arith.constant 0 : index
    %c0_257 = arith.constant 0 : index
    %c0_258 = arith.constant 0 : index
    %378 = vector.load %arg18[%c0_256, %c0_257, %c0_258] : memref<1x16x256xf32, #tpu.memory_space<vmem>>, vector<1x16x256xf32>
    %379 = vector.shape_cast %378 : vector<1x16x256xf32> to vector<16x256xf32>
    %380 = vector.shape_cast %377 : vector<16x256xf32> to vector<1x16x256xf32>
    tpu.vector_store %arg18[%c0_256, %c0_257, %c0_258], %380 {strides = array<i32>} : memref<1x16x256xf32, #tpu.memory_space<vmem>>, vector<1x16x256xf32>,
    return
  }
  func.func @transform_0(%arg0: i32) -> (i32, i32, i32) {
    %c0_i32 = arith.constant 0 : i32
    %c0_i32_0 = arith.constant 0 : i32
    %c0_i32_1 = arith.constant 0 : i32
    return %arg0, %c0_i32, %c0_i32_0 : i32, i32, i32
  }
  func.func @transform_1(%arg0: i32) -> (i32, i32, i32) {
    %c0_i32 = arith.constant 0 : i32
    %c0_i32_0 = arith.constant 0 : i32
    %c0_i32_1 = arith.constant 0 : i32
    %c0_i32_2 = arith.constant 0 : i32
    return %c0_i32, %c0_i32_0, %c0_i32_1 : i32, i32, i32
  }
  func.func @transform_2(%arg0: i32) -> (i32, i32) {
    %c0_i32 = arith.constant 0 : i32
    %c0_i32_0 = arith.constant 0 : i32
    %c0_i32_1 = arith.constant 0 : i32
    return %c0_i32, %c0_i32_0 : i32, i32
  }
  func.func @transform_3(%arg0: i32) -> (i32, i32) {
    %c0_i32 = arith.constant 0 : i32
    %c0_i32_0 = arith.constant 0 : i32
    %c0_i32_1 = arith.constant 0 : i32
    return %c0_i32, %c0_i32_0 : i32, i32
  }
  func.func @transform_4(%arg0: i32) -> (i32, i32, i32) {
    %c0_i32 = arith.constant 0 : i32
    %c0_i32_0 = arith.constant 0 : i32
    %c0_i32_1 = arith.constant 0 : i32
    %c0_i32_2 = arith.constant 0 : i32
    return %c0_i32, %c0_i32_0, %c0_i32_1 : i32, i32, i32
  }
  func.func @transform_5(%arg0: i32) -> (i32, i32) {
    %c0_i32 = arith.constant 0 : i32
    %c0_i32_0 = arith.constant 0 : i32
    %c0_i32_1 = arith.constant 0 : i32
    return %c0_i32, %c0_i32_0 : i32, i32
  }
  func.func @transform_6(%arg0: i32) -> (i32, i32) {
    %c0_i32 = arith.constant 0 : i32
    %c0_i32_0 = arith.constant 0 : i32
    %c0_i32_1 = arith.constant 0 : i32
    return %c0_i32, %c0_i32_0 : i32, i32
  }
  func.func @transform_7(%arg0: i32) -> (i32, i32, i32) {
    %c0_i32 = arith.constant 0 : i32
    %c0_i32_0 = arith.constant 0 : i32
    %c0_i32_1 = arith.constant 0 : i32
    %c0_i32_2 = arith.constant 0 : i32
    return %c0_i32, %c0_i32_0, %c0_i32_1 : i32, i32, i32
  }
  func.func @transform_8(%arg0: i32) -> (i32, i32) {
    %c0_i32 = arith.constant 0 : i32
    %c0_i32_0 = arith.constant 0 : i32
    %c0_i32_1 = arith.constant 0 : i32
    return %c0_i32, %c0_i32_0 : i32, i32
  }
  func.func @transform_9(%arg0: i32) -> (i32, i32) {
    %c0_i32 = arith.constant 0 : i32
    %c0_i32_0 = arith.constant 0 : i32
    %c0_i32_1 = arith.constant 0 : i32
    return %c0_i32, %c0_i32_0 : i32, i32
  }
  func.func @transform_10(%arg0: i32) -> (i32, i32, i32) {
    %c0_i32 = arith.constant 0 : i32
    %c0_i32_0 = arith.constant 0 : i32
    %c0_i32_1 = arith.constant 0 : i32
    %c0_i32_2 = arith.constant 0 : i32
    return %c0_i32, %c0_i32_0, %c0_i32_1 : i32, i32, i32
  }
  func.func @transform_11(%arg0: i32) -> (i32, i32) {
    %c0_i32 = arith.constant 0 : i32
    %c0_i32_0 = arith.constant 0 : i32
    %c0_i32_1 = arith.constant 0 : i32
    return %c0_i32, %c0_i32_0 : i32, i32
  }
  func.func @transform_12(%arg0: i32) -> (i32, i32) {
    %c0_i32 = arith.constant 0 : i32
    %c0_i32_0 = arith.constant 0 : i32
    %c0_i32_1 = arith.constant 0 : i32
    return %c0_i32, %c0_i32_0 : i32, i32
  }
  func.func @transform_13(%arg0: i32) -> (i32, i32) {
    %c0_i32 = arith.constant 0 : i32
    %c0_i32_0 = arith.constant 0 : i32
    %c0_i32_1 = arith.constant 0 : i32
    return %c0_i32, %c0_i32_0 : i32, i32
  }
  func.func @transform_14(%arg0: i32) -> (i32, i32) {
    %c0_i32 = arith.constant 0 : i32
    %c0_i32_0 = arith.constant 0 : i32
    %c0_i32_1 = arith.constant 0 : i32
    return %c0_i32, %c0_i32_0 : i32, i32
  }
  func.func @transform_15(%arg0: i32) -> (i32, i32) {
    %c0_i32 = arith.constant 0 : i32
    %c0_i32_0 = arith.constant 0 : i32
    %c0_i32_1 = arith.constant 0 : i32
    return %c0_i32, %c0_i32_0 : i32, i32
  }
  func.func @transform_16(%arg0: i32) -> (i32, i32) {
    %c0_i32 = arith.constant 0 : i32
    %c0_i32_0 = arith.constant 0 : i32
    %c0_i32_1 = arith.constant 0 : i32
    return %c0_i32, %c0_i32_0 : i32, i32
  }
  func.func @transform_17(%arg0: i32) -> (i32, i32, i32) {
    %c0_i32 = arith.constant 0 : i32
    %c0_i32_0 = arith.constant 0 : i32
    %c0_i32_1 = arith.constant 0 : i32
    return %arg0, %c0_i32, %c0_i32_0 : i32, i32, i32
  }
}

</mosaic_0001>

<bundles_post_ra>
// kernel: tpu_custom_call.1
= control target key start
LH: loop header
LB: loop body
LE: loop exit
PB: predicated region body
PF: predicated region fallthrough
CT: control target
= control target key end

     0   :  { %s3813_s0 = inlined_call_operand.vmem [shape: f32[2,16,256], index: 0, kind: input, shape index: {}]   ;;  %s3814_s1 = inlined_call_operand.vmem [shape: f32[9,8,16], index: 1, kind: input, shape index: {}]   ;;  %s3815_s2 = inlined_call_operand.vmem [shape: f32[8,1], index: 2, kind: input, shape index: {}]   ;;  %s3816_s3 = inlined_call_operand.vmem [shape: f32[8,1], index: 3, kind: input, shape index: {}]   ;;  %s3817_s4 = inlined_call_operand.vmem [shape: f32[9,4,1], index: 4, kind: input, shape index: {}]   ;;  %s3818_s5 = inlined_call_operand.vmem [shape: f32[4,1], index: 5, kind: input, shape index: {}]   ;;  %s3819_s6 = inlined_call_operand.vmem [shape: f32[4,1], index: 6, kind: input, shape index: {}]   ;;  %s3820_s7 = inlined_call_operand.vmem [shape: f32[9,4,1], index: 7, kind: input, shape index: {}]   ;;  %s3821_s8 = inlined_call_operand.vmem [shape: f32[4,1], index: 8, kind: input, shape index: {}]   ;;  %s3822_s9 = inlined_call_operand.vmem [shape: f32[4,1], index: 9, kind: input, shape index: {}]   ;;  %s3823_s10 = inlined_call_operand.vmem [shape: f32[9,8,8], index: 10, kind: input, shape index: {}]   ;;  %s3824_s11 = inlined_call_operand.vmem [shape: f32[8,1], index: 11, kind: input, shape index: {}]   ;;  %s3825_s12 = inlined_call_operand.vmem [shape: f32[8,1], index: 12, kind: input, shape index: {}]   ;;  %s3826_s13 = inlined_call_operand.vmem [shape: f32[16,8], index: 13, kind: input, shape index: {}]   ;;  %s3827_s14 = inlined_call_operand.vmem [shape: f32[16,1], index: 14, kind: input, shape index: {}]   ;;  %s3828_s15 = inlined_call_operand.vmem [shape: f32[16,1], index: 15, kind: input, shape index: {}]   ;;  %s3829_s16 = inlined_call_operand.vmem [shape: f32[16,1], index: 16, kind: input, shape index: {}]   ;;  %s3830_s17 = inlined_call_operand.hbm [shape: f32[2,16,256], index: 17, kind: output, shape index: {}]  }
   0x1   :  { %3854 = sst [smem:[#allocation11_spill]] %s3813_s0 }
   0x2   :  { %3855 = sst [smem:[#allocation12_spill]] %s3814_s1 }
   0x3   :  { %3856 = sst [smem:[#allocation13_spill]] %s3815_s2 }
   0x4   :  { %3857 = sst [smem:[#allocation14_spill]] %s3816_s3 }
   0x5   :  { %3858 = sst [smem:[#allocation15_spill]] %s3818_s5 }
   0x6   :  { %3859 = sst [smem:[#allocation16_spill]] %s3821_s8 }
   0x7   :  { %22 = vsyncpa [#allocation4], 0 }
   0x8   :  { %24 = vsyncpa [#allocation4 + $0x1], 0  ;;  %s2904_s24 = smov 0   ;;  %s2906_s25 = smov 0  }
   0x9   :  { %s2908_s26 = smov 0   ;;  %s2910_s27 = smov 0  }
   0xa LB: > { %3860 = sst [smem:[#allocation6_spill]] %s2789_s24  ;;  %s2925_s28 = sadd.s32 4294967295, %s2801_s27   ;;  %s2801_s27 = sphi %s2910_s27, %s3891_s27   ;;  %s2797_s26 = sphi %s2908_s26, %s3893_s26   ;;  %s2793_s25 = sphi %s2906_s25, %s3895_s25   ;;  %s2789_s24 = sphi %s2904_s24, %s3894_s24  }
   0xb   : > { %3861 = sst [smem:[#allocation7_spill]] %s2797_s26  ;;  %s2463_s29 = sadd.s32 4294967294, %s2801_s27  }
   0xc   : > { %s2929_s0 = sadd.s32 1, %s2801_s27   ;;  %s399_s30 = sadd.s32 1, %s2797_s26 }
   0xd   : > { %3862 = sst [smem:[#allocation8_spill]] %s2929_s0  ;;  %s396_s18 = ssub.s32 %s2801_s27, %s2929_s0 }
   0xe   : > { %p409_p0 = scmp.ne.s32.totalorder %s2797_s26, %s2793_s25  ;;  %p397_p1 = scmp.eq.s32.totalorder %s396_s18, 0 }
   0xf   : > { %p410_p2 = scmp.eq.s32.totalorder %s2925_s28, 1  ;;  %p415_p3 = scmp.ne.s32.totalorder %s2793_s25, %s2789_s24 }
  0x10   : > { %p416_p4 = scmp.eq.s32.totalorder %s2463_s29, 1  ;;  %p2466_p7 = scmp.ge.s32.totalorder %s2801_s27, 1 }
  0x11   : > { %s2940_s19 = scalar_select %p397_p1, %s2797_s26, %s399_s30  }
  0x12   : > { %p2942_p5 = por %p410_p2, %p409_p0  ;;  %p2946_p6 = por %p416_p4, %p415_p3 }
  0x13   : > { %3863 = sst [smem:[#allocation9_spill]] %s2940_s19  ;;  %p490_p8 = scmp.lt.s32.totalorder %s2801_s27, 3 }
  0x14   : > { %s3865_s20 = scalar_select %p2946_p6, 1, 0 }
  0x15   : > { %p491_p9 = pnand %p2466_p7, %p490_p8 }
  0x16   : > { %3866 = sst [smem:[#allocation10_spill]] %s3865_s20  ;;  %p542_p10 = scmp.lt.s32.totalorder (!%p491_p9), %s2925_s28, 1 }
  0x17   : > { %494 = sbr.rel (%p491_p9) target bundleno = 1052 (0x41c), region = 88  ;;  %s3842_s22 = smov (!%p491_p9), 17  }
  0x18   : > { %s3867_s18 = sld [smem:[#allocation11_spill]] (!%p491_p9)  ;;  %s3832_s29 = smov (!%p491_p9), 1  }
  0x19   : > { %s3834_s30 = smov (!%p491_p9), 127   ;;  %s3875_s2 = sld [smem:[#allocation13_spill]] (!%p491_p9) }
  0x1a   : > { %s3876_s8 = sld [smem:[#allocation16_spill]] (!%p491_p9)  ;;  %s3887_s20 = smov (!%p491_p9), 111  }
  0x1b   : > { %s3879_s3 = sld [smem:[#allocation14_spill]] (!%p491_p9)  ;;  %s3888_s24 = smov (!%p491_p9), 17  }
  0x1c   : > { %v2803_v0 = vmov 0.0   ;;  %s543_s21 = scalar_select %p542_p10, %s2925_s28, 1  ;;  %v2810_v8 = vmov 0   ;;  %v2520_v13 = vld [vmem:[%s3817_s4 + $0x4] sm:$0xf]  ;;  %v547_v15 = vlaneseq  ;;  %vm625_vm0 = vcmask 138240  }
  0x1d   : > { %578 = vst [vmem:[#allocation2 + $0x28] sm:$0xff] %v2803_v0  ;;  %2636 = vrot.lane.b32.xlu0 %v2803_v0, %s3842_s22  ;;  %2697 = vset.pattern.permute.xlu2 %v2810_v8  ;;  %vm638_vm3 = vcmask 130048   ;;  %vm769_vm5 = vcmask 121856   ;;  %vm841_vm7 = vcmask 7168   ;;  %s3882_s5 = sld [smem:[#allocation15_spill]]  ;;  %vm972_vm8 = vcmask 1039360  }
  0x1e   : > { %580 = vst [vmem:[#allocation2 + $0x38] sm:$0xff] %v2803_v0  ;;  %s2583_s23 = sshll.u32 %s543_s21, 5  ;;  %s3846_s21 = smov 16   ;;  %2695 = vset.pattern.permute.xlu0 %v2810_v8  ;;  %2696 = vset.pattern.permute.xlu1 %v2810_v8  ;;  %v548_v16 = vand.u32 127, %v547_v15  ;;  %vm1116_vm9 = vcmask 916480   ;;  %vm1044_vm10 = vcmask 924672  }
  0x1f   : > { %s2961_s19 = scalar_lea.vmem %s3867_s18, %s2583_s23  ;;  %s3838_s23 = smov 15   ;;  %v590_v53 = vld [vmem:[%s3875_s2] sm:$0xff]  ;;  %vm1184_vm11 = vcmask 908288  }
  0x20   : > { %v2964_v1 = vld [vmem:[%s2961_s19 + $0x18] sm:$0xff]  ;;  %v2967_v2 = vld [vmem:[%s2961_s19 + $0x8] sm:$0xff]  ;;  %v2974_v3 = vld [vmem:[%s2961_s19 + $0x10] sm:$0xff]  ;;  %s3836_s18 = smov 113   ;;  %v3054_v18 = vadd.s32 128, %v548_v16  ;;  %v554_v20 = vand.u32 15, %v548_v16 }
  0x21   : > { %623 = vrot.lane.b32.xlu1 %v2964_v1, %s3842_s22  ;;  %617 = vrot.lane.b32.xlu2 %v2967_v2, %s3842_s22  ;;  %v2640_v4 = vpack.i.bf16 %v2974_v3, %v2803_v0  ;;  %v2981_v5 = vld [vmem:[%s2961_s19] sm:$0xff]  ;;  %v2645_v6 = vpack.i.bf16 0.0, %v2964_v1  ;;  %v2675_v9 = vpack.i.bf16 %v2964_v1, %v2974_v3  ;;  %v2685_v11 = vpack.i.bf16 0.0, %v2967_v2  ;;  %s3881_s2 = smov 1  }
  0x22   : > { %v2650_v7 = vpack.i.bf16 %v2967_v2, %v2981_v5  ;;  %v2680_v10 = vpack.i.bf16 %v2981_v5, %v2803_v0  ;;  %v561_v21 = vand.u32 15, %v3054_v18  ;;  %vm3061_vm1 = vcmp.ge.s32.totalorder %v554_v20, 1  ;;  %v1262_v59 = vld [vmem:[%s3876_s8] sm:$0xf]  ;;  %s3884_s8 = smov 16  }
  0x23   : > { %vm3098_vm4 = vcmp.lt.s32.totalorder %v554_v20, 15  ;;  %v1242_v63 = vld [vmem:[%s3879_s3] sm:$0xff]  ;;  %s2759_s3 = scalar_lea.hbm %s3830_s17, 64 }
  0x24   : > { %v1297_v24 = vld [vmem:[#allocation2 + $0x28] sm:$0xf0]  ;;  %v3059_v26 = vld [vmem:[#allocation2 + $0x28] sm:$0xf]  ;;  %vm3065_vm2 = vcmp.ge.s32.totalorder %v561_v21, 1  ;;  %vm3122_vm6 = vcmp.lt.s32.totalorder %v561_v21, 15 }
  0x25   : > { %621 = vrot.lane.b32.xlu0 %v2974_v3, %s3842_s22  ;;  %v1303_v25 = vrot.slane %v1297_v24, 4  ;;  %v1296_v20 = vld [vmem:[%s3820_s7] sm:$0xf] }
  0x27   : > { %v3070_v30 = vpack.i.bf16 %v3059_v26, %v1303_v25 }
  0x29   : > { %2641 = vrot.lane.b32.xlu2 %v2640_v4, %s3846_s21  ;;  %615 = vrot.lane.b32.xlu1 %v2981_v5, %s3842_s22 }
  0x2d   : > { %2646 = vrot.lane.b32.xlu0 %v2645_v6, %s3846_s21 }
  0x31   : > { %2656 = vrot.lane.b32.xlu2 %v2803_v0, %s3838_s23  ;;  %2651 = vrot.lane.b32.xlu1 %v2650_v7, %s3846_s21 }
  0x35   : > { %765 = vrot.lane.b32.xlu0 %v2974_v3, %s3838_s23 }
  0x39   : > { %2661 = vrot.lane.b32.xlu2 %v2803_v0, %s3832_s29  ;;  %767 = vrot.lane.b32.xlu1 %v2964_v1, %s3838_s23 }
  0x3d   : > { %837 = vrot.lane.b32.xlu0 %v2974_v3, %s3832_s29 }
  0x41   : > { %759 = vrot.lane.b32.xlu2 %v2981_v5, %s3838_s23  ;;  %839 = vrot.lane.b32.xlu1 %v2964_v1, %s3832_s29 }
  0x45   : > { %761 = vrot.lane.b32.xlu0 %v2967_v2, %s3838_s23  ;;  %s3883_s23 = smov 127  }
  0x49   : > { %833 = vrot.lane.b32.xlu2 %v2967_v2, %s3832_s29  ;;  %831 = vrot.lane.b32.xlu1 %v2981_v5, %s3832_s29  ;;  %s3844_s29 = smov 112  }
  0x4d   : > { %966 = vrot.lane.b32.xlu0 %v2974_v3, %s3834_s30 }
  0x51   : > { %2666 = vrot.lane.b32.xlu2 %v2803_v0, %s3834_s30  ;;  %968 = vrot.lane.b32.xlu1 %v2964_v1, %s3834_s30 }
  0x55   : > { %960 = vrot.lane.b32.xlu0 %v2981_v5, %s3834_s30 }
  0x59   : > { %1038 = vrot.lane.b32.xlu2 %v2974_v3, %s3836_s18  ;;  %962 = vrot.lane.b32.xlu1 %v2967_v2, %s3834_s30  ;;  %s3840_s30 = smov 111  }
  0x5d   : > { %1040 = vrot.lane.b32.xlu0 %v2964_v1, %s3836_s18 }
  0x61   : > { %2676 = vrot.lane.b32.xlu2 %v2675_v9, %s3844_s29  ;;  %2671 = vrot.lane.b32.xlu1 %v2803_v0, %s3836_s18  ;;  %v1268_v9 = vld [vmem:[%s3817_s4] sm:$0xf] }
  0x65   : > { %2681 = vrot.lane.b32.xlu0 %v2680_v10, %s3844_s29 }
  0x69   : > { %1034 = vrot.lane.b32.xlu2 %v2967_v2, %s3836_s18  ;;  %1032 = vrot.lane.b32.xlu1 %v2981_v5, %s3836_s18 }
  0x6d   : > { %2686 = vrot.lane.b32.xlu0 %v2685_v11, %s3844_s29 }
  0x71   : > { %1180 = vrot.lane.b32.xlu2 %v2964_v1, %s3840_s30  ;;  %1178 = vrot.lane.b32.xlu1 %v2974_v3, %s3840_s30 }
  0x75   : > { %2691 = vrot.lane.b32.xlu0 %v2803_v0, %s3840_s30 }
  0x79   : > { %1174 = vrot.lane.b32.xlu2 %v2967_v2, %s3840_s30  ;;  %1172 = vrot.lane.b32.xlu1 %v2981_v5, %s3840_s30  ;;  %s3872_s30 = sld [smem:[#allocation12_spill]] }
  0x7b   : > { %v618_v12 = vpop.permute.xlu2 %617 }
  0x7d   : > { %593 = vperm.xlu0 %2695, %v590_v53  }
  0x7f   : > { %v596_v42 = vld [vmem:[%s3872_s30] sm:$0xff]  ;;  %v2476_v52 = vld [vmem:[%s3872_s30 + $0x8] sm:$0xff]  ;;  %v2479_v8 = vld [vmem:[%s3872_s30 + $0x10] sm:$0xff] }
  0x80   : > { %v2486_v24 = vld [vmem:[%s3872_s30 + $0x18] sm:$0xff] }
  0x81   : > { %1331 = vperm.xlu2 %2697, %v2520_v13   ;;  %1247 = vperm.xlu1 %2696, %v1242_v63  }
  0x83   : > { %v2642_v14 = vpop.permute.xlu2 %2641 }
  0x84   : > { %v2644_v31 = vunpack.i.h.bf16 %v2642_v14  ;;  %v2643_v32 = vunpack.i.l.bf16 %v2642_v14 }
  0x85   : > { %1289 = vperm.xlu0 %2695, %v1268_v9  }
  0x86   : > { %v700_v39 = vsel %vm638_vm3, %v2643_v32, %v2644_v31 }
  0x89   : > { %2699 = vrot.lane.b32.xlu2 %v3070_v30, %s3842_s22  ;;  %s539_s22 = sand.u32 1, %s2793_s25  }
  0x8b   : > { %v3052_v17 = vpop.permute.xlu2 %2656 }
  0x8c   : > { %v2659_v54 = vunpack.i.h.bf16 %v3052_v17  ;;  %v2658_v55 = vunpack.i.l.bf16 %v3052_v17  ;;  %v1256_v17 = vld [vmem:[%s3882_s5] sm:$0xf]  ;;  %s3885_s5 = smov 112  }
  0x8d   : > { %2709 = vrot.lane.b32.xlu0 %v3070_v30, %s3881_s2 }
  0x8f   : > { %v2637_v19 = vpop.permute.xlu0 %2636 }
  0x90   : > { %v2638_v27 = vunpack.i.l.bf16 %v2637_v19  ;;  %v2639_v36 = vunpack.i.h.bf16 %v2637_v19 }
  0x91   : > { %1359 = vrot.lane.b32.xlu2 %v1303_v25, %s3846_s21  ;;  %s3880_s21 = smov 15  }
  0x93   : > { %v624_v22 = vpop.permute.xlu1 %623  ;;  %v3057_v23 = vpop.permute.xlu2 %2661 }
  0x94   : > { %v2663_v10 = vunpack.i.l.bf16 %v3057_v23  ;;  %v2664_v19 = vunpack.i.h.bf16 %v3057_v23 }
  0x97   : > { %v622_v33 = vpop.permute.xlu0 %621 }
  0x98   : > { %v628_v34 = vsel %vm625_vm0, %v2638_v27, %v622_v33  ;;  %v629_v35 = vsel %vm625_vm0, %v622_v33, %v624_v22 }
  0x99   : > { %2470 = vmatpush.msk.msra.mxu2 %vm3061_vm1, %v628_v34  ;;  %2473 = vmatpush.msk.msra.mxu3 %vm3065_vm2, %v629_v35 }
  0x9a   : > { %1265 = vperm.xlu2 %2697, %v1262_v59  }
  0x9b   : > { %v3080_v37 = vpop.permute.xlu2 %759  ;;  %v616_v38 = vpop.permute.xlu1 %615 }
  0x9c   : > { %v626_v40 = vsel %vm625_vm0, %v2639_v36, %v616_v38  ;;  %v627_v41 = vsel %vm625_vm0, %v616_v38, %v618_v12  ;;  %v770_v61 = vsel %vm769_vm5, %v2659_v54, %v3080_v37  ;;  %v2527_v38 = vld [vmem:[%s3820_s7 + $0x10] sm:$0xf]  ;;  %v2528_v54 = vld [vmem:[%s3817_s4 + $0x14] sm:$0xf] }
  0x9d   : > { %2471 = vmatpush.msk.msra.mxu2 %vm3061_vm1, %v626_v40  ;;  %2474 = vmatpush.msk.msra.mxu3 %vm3065_vm2, %v627_v41 }
  0x9e   : > { %2475 = vmatmul.msk.f32.vlgmr.msra.gmra.mxu3 %vm638_vm3, %v596_v42  ;;  %2472 = vmatmul.msk.f32.vlgmr.msra.gmra.mxu2 %vm638_vm3, %v596_v42 }
  0x9f   : > { %723 = vmatpush.msrb.mxu2 %v700_v39  ;;  %v2647_v43 = vpop.permute.xlu0 %2646  ;;  %v2524_v39 = vld [vmem:[%s3817_s4 + $0xc] sm:$0xf] }
  0xa0   : > { %v2648_v44 = vunpack.i.l.bf16 %v2647_v43  ;;  %v2649_v48 = vunpack.i.h.bf16 %v2647_v43  ;;  %v2496_v43 = vld [vmem:[%s3872_s30 + $0x28] sm:$0xff] }
  0xa2   : > { %v701_v45 = vsel %vm638_vm3, %v2644_v31, %v2648_v44  ;;  %2704 = vrot.lane.b32.xlu2 %v3070_v30, %s3880_s21  ;;  %v2521_v31 = vld [vmem:[%s3820_s7 + $0x4] sm:$0xf] }
  0xa3   : > { %v3096_v46 = vpop.permute.xlu2 %833  ;;  %743 = vmatpush.msrb.mxu3 %v701_v45  ;;  %v2652_v47 = vpop.permute.xlu1 %2651 }
  0xa4   : > { %v2654_v49 = vunpack.i.h.bf16 %v2652_v47  ;;  %v2653_v50 = vunpack.i.l.bf16 %v2652_v47  ;;  %v1522_v47 = vld [vmem:[#allocation2 + $0x38] sm:$0xf0] }
  0xa6   : > { %v698_v56 = vsel %vm638_vm3, %v2649_v48, %v2653_v50  ;;  %v699_v57 = vsel %vm638_vm3, %v2653_v50, %v2654_v49  ;;  %v1528_v48 = vrot.slane %v1522_v47, 4  ;;  %v3229_v49 = vld [vmem:[#allocation2 + $0x38] sm:$0xf] }
  0xa7   : > { %v766_v58 = vpop.permute.xlu0 %765  ;;  %724 = vmatpush.msrb.mxu2 %v698_v56  ;;  %744 = vmatpush.msrb.mxu3 %v699_v57 }
  0xa8   : > { %v772_v60 = vsel %vm769_vm5, %v2658_v55, %v766_v58  ;;  %2478 = vmatmul.msk.f32.vlgmr.msrb.gmra.mxu3 %vm638_vm3, %v2476_v52  ;;  %2477 = vmatmul.msk.f32.vlgmr.msrb.gmra.mxu2 %vm638_vm3, %v2476_v52  ;;  %v3233_v52 = vpack.i.bf16 %v3229_v49, %v1528_v48 }
  0xa9   : > { %2480 = vmatpush.msk.msra.mxu0 %vm3098_vm4, %v772_v60 }
  0xaa   : > { %1259 = vperm.xlu2 %2697, %v1256_v17  }
  0xab   : > { %2481 = vmatpush.msk.msra.mxu0 %vm3098_vm4, %v770_v61  ;;  %v3131_v4 = vpop.permute.xlu2 %2666  ;;  %v768_v6 = vpop.permute.xlu1 %767  ;;  %v2530_v61 = vld [vmem:[%s3817_s4 + $0x18] sm:$0xf] }
  0xac   : > { %v773_v7 = vsel %vm769_vm5, %v766_v58, %v768_v6  ;;  %2482 = vmatmul.msk.f32.vlgmr.msra.gmra.mxu0 %vm638_vm3, %v2479_v8  ;;  %v2668_v30 = vunpack.i.l.bf16 %v3131_v4  ;;  %v2669_v40 = vunpack.i.h.bf16 %v3131_v4  ;;  %v2503_v4 = vld [vmem:[%s3872_s30 + $0x30] sm:$0xff] }
  0xad   : > { %918 = vmatpush.msrb.mxu0 %v2974_v3  ;;  %2483 = vmatpush.msk.msra.mxu1 %vm3122_vm6, %v773_v7  ;;  %v2532_v3 = vld [vmem:[%s3817_s4 + $0x1c] sm:$0xf]  ;;  %v2531_v7 = vld [vmem:[%s3820_s7 + $0x18] sm:$0xf] }
  0xae   : > { %1600 = vperm.xlu1 %2696, %v2532_v3  }
  0xaf   : > { %919 = vmatpush.msrb.mxu0 %v2981_v5  ;;  %v838_v11 = vpop.permute.xlu0 %837  ;;  %v2493_v5 = vld [vmem:[%s3872_s30 + $0x20] sm:$0xff] }
  0xb0   : > { %v844_v12 = vsel %vm841_vm7, %v2663_v10, %v838_v11 }
  0xb1   : > { %2487 = vmatpush.msk.msra.mxu2 %vm3061_vm1, %v844_v12 }
  0xb3   : > { %v3154_v13 = vpop.permute.xlu2 %1038  ;;  %v840_v14 = vpop.permute.xlu1 %839 }
  0xb4   : > { %v845_v15 = vsel %vm841_vm7, %v838_v11, %v840_v14  ;;  %2494 = vmatmul.msk.f32.vlgmr.msrb.gmra.mxu0 %vm638_vm3, %v2493_v5 }
  0xb5   : > { %2490 = vmatpush.msk.msra.mxu3 %vm3065_vm2, %v845_v15 }
  0xb6   : > { %1320 = vperm.xlu1 %2696, %v1296_v20  }
  0xb7   : > { %v762_v16 = vpop.permute.xlu0 %761 }
  0xb8   : > { %v771_v18 = vsel %vm769_vm5, %v3080_v37, %v762_v16 }
  0xb9   : > { %2484 = vmatpush.msk.msra.mxu1 %vm3122_vm6, %v771_v18  ;;  %v2522_v18 = vld [vmem:[%s3817_s4 + $0x8] sm:$0xf] }
  0xba   : > { %2485 = vmatmul.msk.f32.vlgmr.msra.gmra.mxu1 %vm638_vm3, %v2479_v8 }
  0xbb   : > { %v3177_v21 = vpop.permute.xlu2 %2676  ;;  %v832_v22 = vpop.permute.xlu1 %831  ;;  %938 = vmatpush.msrb.mxu1 %v2964_v1  ;;  %v2523_v1 = vld [vmem:[%s3820_s7 + $0x8] sm:$0xf] }
  0xbc   : > { %v842_v25 = vsel %vm841_vm7, %v2664_v19, %v832_v22  ;;  %v843_v23 = vsel %vm841_vm7, %v832_v22, %v3096_v46  ;;  %1412 = vperm.xlu2 %2697, %v2523_v1   ;;  %v2679_v35 = vunpack.i.h.bf16 %v3177_v21  ;;  %v2678_v36 = vunpack.i.l.bf16 %v3177_v21 }
  0xbd   : > { %2488 = vmatpush.msk.msra.mxu2 %vm3061_vm1, %v842_v25  ;;  %2491 = vmatpush.msk.msra.mxu3 %vm3065_vm2, %v843_v23  ;;  %v2525_v23 = vld [vmem:[%s3820_s7 + $0xc] sm:$0xf] }
  0xbe   : > { %2492 = vmatmul.msk.f32.vlgmr.msra.gmra.mxu3 %vm638_vm3, %v2486_v24  ;;  %2489 = vmatmul.msk.f32.vlgmr.msra.gmra.mxu2 %vm638_vm3, %v2486_v24  ;;  %v1119_v44 = vsel %vm1116_vm9, %v2678_v36, %v2679_v35 }
  0xbf   : > { %v967_v27 = vpop.permute.xlu0 %966  ;;  %939 = vmatpush.msrb.mxu1 %v2967_v2  ;;  %1356 = vperm.xlu1 %2696, %v2521_v31   ;;  %v2526_v31 = vld [vmem:[%s3817_s4 + $0x10] sm:$0xf] }
  0xc2   : > { %2495 = vmatmul.msk.f32.vlgmr.msrb.gmra.mxu1 %vm638_vm3, %v2493_v5  ;;  %v2510_v5 = vld [vmem:[%s3872_s30 + $0x38] sm:$0xff] }
  0xc3   : > { %v1035_v32 = vpop.permute.xlu2 %1034  ;;  %v969_v33 = vpop.permute.xlu1 %968 }
  0xc4   : > { %v975_v34 = vsel %vm972_vm8, %v967_v27, %v969_v33  ;;  %v976_v2 = vsel %vm972_vm8, %v969_v33, %v2668_v30  ;;  %1480 = vperm.xlu2 %2697, %v2527_v38   ;;  %v2513_v27 = vld [vmem:[%s3872_s30 + $0x40] sm:$0xff]  ;;  %s3886_s30 = smov 113   ;;  %v2533_v33 = vld [vmem:[%s3820_s7 + $0x1c] sm:$0xf] }
  0xc5   : > { %2497 = vmatpush.msk.msrb.mxu2 %vm3098_vm4, %v975_v34  ;;  %2500 = vmatpush.msk.msrb.mxu3 %vm3122_vm6, %v976_v2  ;;  %v2535_v34 = vld [vmem:[%s3820_s7 + $0x20] sm:$0xf] }
  0xc7   : > { %v961_v37 = vpop.permute.xlu0 %960  ;;  %1435 = vperm.xlu1 %2696, %v2524_v39  }
  0xcb   : > { %v3216_v41 = vpop.permute.xlu2 %1180  ;;  %v963_v42 = vpop.permute.xlu1 %962 }
  0xcc   : > { %v973_v45 = vsel %vm972_vm8, %v961_v37, %v963_v42  ;;  %v974_v46 = vsel %vm972_vm8, %v963_v42, %v2669_v40  ;;  %2714 = vrot.lane.b32.xlu2 %v3233_v52, %s3883_s23 }
  0xcd   : > { %2498 = vmatpush.msk.msrb.mxu2 %vm3098_vm4, %v973_v45  ;;  %2501 = vmatpush.msk.msrb.mxu3 %vm3122_vm6, %v974_v46 }
  0xce   : > { %2502 = vmatmul.msk.f32.vlgmr.msrb.gmra.mxu3 %vm638_vm3, %v2496_v43  ;;  %2499 = vmatmul.msk.f32.vlgmr.msrb.gmra.mxu2 %vm638_vm3, %v2496_v43 }
  0xcf   : > { %1142 = vmatpush.msra.mxu2 %v1119_v44  ;;  %v1041_v50 = vpop.permute.xlu0 %1040  ;;  %1511 = vperm.xlu1 %2696, %v2528_v54  }
  0xd0   : > { %v1047_v53 = vsel %vm1044_vm10, %v3154_v13, %v1041_v50 }
  0xd1   : > { %2504 = vmatpush.msk.msra.mxu0 %vm3061_vm1, %v1047_v53 }
  0xd3   : > { %v1175_v55 = vpop.permute.xlu2 %1174  ;;  %v2672_v56 = vpop.permute.xlu1 %2671 }
  0xd4   : > { %v2674_v57 = vunpack.i.h.bf16 %v2672_v56  ;;  %v2673_v58 = vunpack.i.l.bf16 %v2672_v56  ;;  %1566 = vperm.xlu2 %2697, %v2530_v61  }
  0xd6   : > { %v1048_v59 = vsel %vm1044_vm10, %v1041_v50, %v2673_v58  ;;  %v1046_v60 = vsel %vm1044_vm10, %v1035_v32, %v2674_v57 }
  0xd7   : > { %v2682_v63 = vpop.permute.xlu0 %2681  ;;  %2507 = vmatpush.msk.msra.mxu1 %vm3065_vm2, %v1048_v59  ;;  %1589 = vperm.xlu1 %2696, %v2531_v7  }
  0xd8   : > { %v2683_v6 = vunpack.i.l.bf16 %v2682_v63  ;;  %v2684_v13 = vunpack.i.h.bf16 %v2682_v63 }
  0xd9   : > { %2508 = vmatpush.msk.msra.mxu1 %vm3065_vm2, %v1046_v60 }
  0xda   : > { %2509 = vmatmul.msk.f32.vlgmr.msra.gmra.mxu1 %vm638_vm3, %v2503_v4  ;;  %v1120_v8 = vsel %vm1116_vm9, %v2679_v35, %v2683_v6 }
  0xdb   : > { %v3261_v9 = vpop.permute.xlu2 %1331  ;;  %v1033_v10 = vpop.permute.xlu1 %1032  ;;  %1162 = vmatpush.msra.mxu3 %v1120_v8 }
  0xdc   : > { %v1334_v11 = vmul.f32 %v3261_v9, %v3059_v26  ;;  %v1045_v12 = vsel %vm1044_vm10, %v1033_v10, %v1035_v32  ;;  %v2529_v32 = vld [vmem:[%s3820_s7 + $0x14] sm:$0xf] }
  0xdd   : > { %2505 = vmatpush.msk.msra.mxu0 %vm3061_vm1, %v1045_v12 }
  0xde   : > { %1340 = vrot.lane.b32.xlu0 %v1334_v11, %s3884_s8  ;;  %2506 = vmatmul.msk.f32.vlgmr.msra.gmra.mxu0 %vm638_vm3, %v2503_v4 }
  0xdf   : > { %v2687_v3 = vpop.permute.xlu0 %2686  ;;  %1632 = vrot.lane.b32.xlu1 %v1528_v48, %s3885_s5 }
  0xe0   : > { %v2689_v14 = vunpack.i.h.bf16 %v2687_v3  ;;  %v2688_v15 = vunpack.i.l.bf16 %v2687_v3 }
  0xe2   : > { %v1117_v26 = vsel %vm1116_vm9, %v2684_v13, %v2688_v15  ;;  %v1118_v16 = vsel %vm1116_vm9, %v2688_v15, %v2689_v14 }
  0xe3   : > { %v1179_v17 = vpop.permute.xlu1 %1178  ;;  %1143 = vmatpush.msra.mxu2 %v1117_v26  ;;  %1163 = vmatpush.msra.mxu3 %v1118_v16 }
  0xe4   : > { %v1187_v19 = vsel %vm1184_vm11, %v1179_v17, %v3216_v41  ;;  %2511 = vmatmul.msk.f32.vlgmr.msra.gmra.mxu2 %vm638_vm3, %v2510_v5  ;;  %2512 = vmatmul.msk.f32.vlgmr.msra.gmra.mxu3 %vm638_vm3, %v2510_v5 }
  0xe5   : > { %2514 = vmatpush.msk.msrb.mxu0 %vm3098_vm4, %v1187_v19 }
  0xe6   : > { %1389 = vperm.xlu0 %2695, %v2522_v18  }
  0xe7   : > { %v2692_v20 = vpop.permute.xlu0 %2691 }
  0xe8   : > { %v2694_v21 = vunpack.i.h.bf16 %v2692_v20  ;;  %v2693_v22 = vunpack.i.l.bf16 %v2692_v20  ;;  %v3329_v20 = vpop.permute.xlu2 %2699 }
  0xea   : > { %v1188_v24 = vsel %vm1184_vm11, %v3216_v41, %v2693_v22  ;;  %v1186_v30 = vsel %vm1184_vm11, %v1175_v55, %v2694_v21 }
  0xeb   : > { %v1173_v25 = vpop.permute.xlu1 %1172  ;;  %2517 = vmatpush.msk.msrb.mxu1 %vm3122_vm6, %v1188_v24 }
  0xec   : > { %v1185_v1 = vsel %vm1184_vm11, %v1173_v25, %v1175_v55 }
  0xed   : > { %2515 = vmatpush.msk.msrb.mxu0 %vm3098_vm4, %v1185_v1  ;;  %2518 = vmatpush.msk.msrb.mxu1 %vm3122_vm6, %v1186_v30 }
  0xee   : > { %1458 = vperm.xlu0 %2695, %v2525_v23   ;;  %2516 = vmatmul.msk.f32.vlgmr.msrb.gmra.mxu0 %vm638_vm3, %v2513_v27 }
  0xef   : > { %2519 = vmatmul.msk.f32.vlgmr.msrb.gmra.mxu1 %vm638_vm3, %v2513_v27  ;;  %v594_v38 = vpop.permute.xlu0 %593 }
  0xf0   : > { %v3339_v22 = vpop.permute.xlu2 %1359 }
  0xf3   : > { %v1248_v14 = vpop.permute.xlu1 %1247 }
  0xf6   : > { %1469 = vperm.xlu0 %2695, %v2526_v31  }
  0xf7   : > { %v3331_v21 = vpop.permute.xlu0 %1289 }
  0xf8   : > { %v3349_v1 = vpop.permute.xlu2 %1265 }
  0xfe   : > { %1543 = vperm.xlu0 %2695, %v2529_v32  }
  0xff   : > { %v3344_v23 = vpop.permute.xlu0 %2709 }
 0x106   : > { %2719 = vrot.lane.b32.xlu0 %v3233_v52, %s3886_s30 }
 0x10e   : > { %1625 = vperm.xlu0 %2695, %v2533_v33  }
 0x116   : > { %2724 = vrot.lane.b32.xlu0 %v3233_v52, %s3887_s20 }
 0x11e   : > { %1681 = vperm.xlu0 %2695, %v2535_v34   ;;  %v3363_v34 = vpop.permute.xlu2 %2704 }
 0x121   : > { %v659_v2 = vpop.f32.mrf.mxu2  ;;  %v679_v35 = vpop.f32.mrf.mxu3 }
 0x122   : > { %v682_v40 = vadd.f32 %v659_v2, %v594_v38  ;;  %v683_v42 = vadd.f32 %v679_v35, %v594_v38  ;;  %v1601_v38 = vpop.permute.xlu1 %1600 }
 0x126   : > { %v3378_v35 = vpop.permute.xlu2 %1259 }
 0x129   : > { %v802_v39 = vpop.f32.mrf.mxu0 }
 0x12b   : > { %v726_v36 = vpop.f32.mrf.mxu2  ;;  %v746_v37 = vpop.f32.mrf.mxu3 }
 0x12c   : > { %v749_v43 = vadd.f32 %v726_v36, %v682_v40  ;;  %v750_v46 = vadd.f32 %v746_v37, %v683_v42 }
 0x12e   : > { %v825_v47 = vadd.f32 %v802_v39, %v749_v43  ;;  %v3388_v42 = vpop.permute.xlu2 %1412 }
 0x131   : > { %v921_v48 = vpop.f32.mrf.mxu0 }
 0x137   : > { %v822_v41 = vpop.f32.mrf.mxu1 }
 0x138   : > { %v826_v52 = vadd.f32 %v822_v41, %v750_v46  ;;  %v3398_v46 = vpop.permute.xlu2 %1480 }
 0x13f   : > { %v941_v50 = vpop.f32.mrf.mxu1 }
 0x141   : > { %v874_v44 = vpop.f32.mrf.mxu2  ;;  %v894_v45 = vpop.f32.mrf.mxu3 }
 0x142   : > { %v897_v53 = vadd.f32 %v874_v44, %v825_v47  ;;  %v898_v54 = vadd.f32 %v894_v45, %v826_v52  ;;  %v3391_v44 = vpop.permute.xlu1 %1320  ;;  %v1605_v47 = vmul.f32 %v1601_v38, %v3229_v49 }
 0x144   : > { %v944_v57 = vadd.f32 %v921_v48, %v897_v53  ;;  %v945_v58 = vadd.f32 %v941_v50, %v898_v54  ;;  %v1688_v53 = vld [vmem:[%s3819_s6] sm:$0xf]  ;;  %v3413_v54 = vpop.permute.xlu2 %2714 }
 0x14a   : > { %v3406_v50 = vpop.permute.xlu1 %1356 }
 0x150   : > { %v3359_v31 = vpop.permute.xlu0 %1340 }
 0x151   : > { %v1005_v55 = vpop.f32.mrf.mxu2  ;;  %v1025_v56 = vpop.f32.mrf.mxu3 }
 0x152   : > { %v1028_v61 = vadd.f32 %v1005_v55, %v944_v57  ;;  %v1029_v63 = vadd.f32 %v1025_v56, %v945_v58  ;;  %v3417_v49 = vpop.permute.xlu1 %1435  ;;  %v1567_v56 = vpop.permute.xlu2 %1566  ;;  %v1700_v57 = vld [vmem:[%s3822_s9] sm:$0xf] }
 0x157   : > { %v1097_v60 = vpop.f32.mrf.mxu1 }
 0x158   : > { %v1101_v8 = vadd.f32 %v1097_v60, %v1029_v63  ;;  %v3370_v2 = vpop.permute.xlu0 %1389  ;;  %v2702_v60 = vunpack.i.h.bf16 %v3329_v20 }
 0x15a   : > { %v3428_v58 = vpop.permute.xlu1 %1511 }
 0x15b   : > { %v1077_v59 = vpop.f32.mrf.mxu0 }
 0x15c   : > { %v1100_v6 = vadd.f32 %v1077_v59, %v1028_v61 }
 0x160   : > { %v3382_v39 = vpop.permute.xlu0 %1458 }
 0x167   : > { %v1145_v4 = vpop.f32.mrf.mxu2  ;;  %v1165_v7 = vpop.f32.mrf.mxu3 }
 0x168   : > { %v1168_v10 = vadd.f32 %v1145_v4, %v1100_v6  ;;  %v1169_v11 = vadd.f32 %v1165_v7, %v1101_v8  ;;  %v3393_v45 = vpop.permute.xlu0 %1469  ;;  %v3440_v6 = vpop.permute.xlu1 %1589 }
 0x16b   : > { %v1217_v12 = vpop.f32.mrf.mxu0 }
 0x16c   : > { %v1240_v3 = vadd.f32 %v1217_v12, %v1168_v10  ;;  %v1237_v13 = vpop.f32.mrf.mxu1  ;;  %v2534_v10 = vld [vmem:[%s3817_s4 + $0x20] sm:$0xf] }
 0x16d   : > { %v1241_v15 = vadd.f32 %v1237_v13, %v1169_v11  ;;  %v2717_v11 = vunpack.i.h.bf16 %v3413_v54 }
 0x16e   : > { %vm1243_vm12 = vcmp.gt.f32.partialorder %v1240_v3, 0.0  ;;  %v1250_v5 = vmul.f32 %v1248_v14, %v1240_v3 }
 0x16f   : > { %vm1244_vm13 = vcmp.gt.f32.partialorder %v1241_v15, 0.0  ;;  %v1251_v26 = vmul.f32 %v1248_v14, %v1241_v15 }
 0x170   : > { %v1252_v16 = vsel %vm1243_vm12, %v1240_v3, %v1250_v5  ;;  %v3408_v52 = vpop.permute.xlu0 %1543  ;;  %v3449_v12 = vpop.permute.xlu1 %1632 }
 0x171   : > { %1254 = vst [vmem:[#allocation2 + $0x20] sm:$0xff] %v1252_v16  ;;  %v1253_v17 = vsel %vm1244_vm13, %v1241_v15, %v1251_v26 }
 0x172   : > { %1255 = vst [vmem:[#allocation2 + $0x8] sm:$0xff] %v1253_v17 }
 0x178   : > { %v3319_v18 = vld [vmem:[#allocation2 + $0x20] sm:$0xf]  ;;  %v1298_v27 = vld [vmem:[#allocation2 + $0x20] sm:$0xf0] }
 0x179   : > { %v3321_v19 = vld [vmem:[#allocation2 + $0x8] sm:$0xf]  ;;  %1277 = vrot.lane.b32.xlu2 %v3319_v18, %s3888_s24  ;;  %v3341_v25 = vld [vmem:[#allocation2 + $0x20] sm:$0xf]  ;;  %v3351_v30 = vrot.slane %v1298_v27, 4  ;;  %v1335_v48 = vmul.f32 %v3261_v9, %v3319_v18 }
 0x17a   : > { %1379 = vrot.lane.b32.xlu1 %v3321_v19, %s3880_s21  ;;  %1279 = vrot.lane.b32.xlu0 %v3321_v19, %s3888_s24  ;;  %v1492_v24 = vld [vmem:[#allocation2 + $0x8] sm:$0xf]  ;;  %v1299_v32 = vld [vmem:[#allocation2 + $0x8] sm:$0xf0]  ;;  %v1520_v36 = vld [vmem:[#allocation2 + $0x20] sm:$0xf0]  ;;  %v1336_v37 = vmul.f32 %v3261_v9, %v3321_v19  ;;  %v3419_v9 = vpop.permute.xlu0 %2719  ;;  %v1603_v4 = vmul.f32 %v1601_v38, %v3341_v25 }
 0x17b   : > { %v3361_v33 = vrot.slane %v1299_v32, 4  ;;  %v1526_v40 = vrot.slane %v1520_v36, 4  ;;  %v1521_v41 = vld [vmem:[#allocation2 + $0x8] sm:$0xf0]  ;;  %v1604_v55 = vmul.f32 %v1601_v38, %v1492_v24 }
 0x17c   : > { %v1527_v43 = vrot.slane %v1521_v41, 4 }
 0x181   : > { %1425 = vrot.lane.b32.xlu2 %v3321_v19, %s3881_s2 }
 0x182   : > { %1423 = vrot.lane.b32.xlu1 %v3319_v18, %s3881_s2  ;;  %1377 = vrot.lane.b32.xlu0 %v3319_v18, %s3880_s21  ;;  %v3430_v59 = vpop.permute.xlu0 %1625 }
 0x189   : > { %1499 = vrot.lane.b32.xlu2 %v1492_v24, %s3883_s23 }
 0x18a   : > { %1497 = vrot.lane.b32.xlu1 %v3341_v25, %s3883_s23  ;;  %1554 = vrot.lane.b32.xlu0 %v1492_v24, %s3886_s30  ;;  %v3442_v7 = vpop.permute.xlu0 %2724 }
 0x18b   : > { %v2727_v17 = vunpack.i.h.bf16 %v3442_v7 }
 0x191   : > { %1552 = vrot.lane.b32.xlu2 %v3341_v25, %s3886_s30 }
 0x192   : > { %1644 = vrot.lane.b32.xlu1 %v3341_v25, %s3887_s20  ;;  %1308 = vrot.lane.b32.xlu0 %v3351_v30, %s3888_s24  ;;  %v3451_v13 = vpop.permute.xlu0 %1681 }
 0x199   : > { %1646 = vrot.lane.b32.xlu2 %v1492_v24, %s3887_s20  ;;  %v2712_v24 = vunpack.i.h.bf16 %v3344_v23 }
 0x19a   : > { %1310 = vrot.lane.b32.xlu1 %v3361_v33, %s3888_s24  ;;  %1361 = vrot.lane.b32.xlu0 %v3351_v30, %s3884_s8 }
 0x1a1   : > { %1448 = vrot.lane.b32.xlu2 %v3361_v33, %s3881_s2 }
 0x1a2   : > { %1363 = vrot.lane.b32.xlu1 %v3361_v33, %s3884_s8  ;;  %1400 = vrot.lane.b32.xlu0 %v3351_v30, %s3880_s21 }
 0x1a9   : > { %1344 = vrot.lane.b32.xlu2 %v1336_v37, %s3884_s8 }
 0x1aa   : > { %1402 = vrot.lane.b32.xlu1 %v3361_v33, %s3880_s21  ;;  %1529 = vrot.lane.b32.xlu0 %v1526_v40, %s3883_s23 }
 0x1b1   : > { %1577 = vrot.lane.b32.xlu2 %v1527_v43, %s3886_s30 }
 0x1b2   : > { %1446 = vrot.lane.b32.xlu1 %v3351_v30, %s3881_s2  ;;  %1630 = vrot.lane.b32.xlu0 %v1527_v43, %s3885_s5 }
 0x1b9   : > { %1628 = vrot.lane.b32.xlu2 %v1526_v40, %s3885_s5 }
 0x1ba   : > { %1613 = vrot.lane.b32.xlu0 %v1605_v47, %s3885_s5  ;;  %1342 = vrot.lane.b32.xlu1 %v1335_v48, %s3884_s8 }
 0x1c1   : > { %1669 = vrot.lane.b32.xlu2 %v1527_v43, %s3887_s20 }
 0x1c2   : > { %1693 = vperm.xlu0 %2695, %v1688_v53   ;;  %1531 = vrot.lane.b32.xlu1 %v1527_v43, %s3883_s23 }
 0x1c9   : > { %1611 = vrot.lane.b32.xlu2 %v1604_v55, %s3885_s5 }
 0x1ca   : > { %1575 = vrot.lane.b32.xlu1 %v1526_v40, %s3886_s30  ;;  %1911 = vrot.lane.b32.xlu0 %v2803_v0, %s3881_s2 }
 0x1d1   : > { %1705 = vperm.xlu2 %2697, %v1700_v57  }
 0x1d2   : > { %1667 = vrot.lane.b32.xlu1 %v1526_v40, %s3887_s20  ;;  %v2722_v40 = vunpack.i.h.bf16 %v3419_v9 }
 0x1d3   : > { %v1278_v61 = vpop.permute.xlu2 %1277 }
 0x1d4   : > { %v3435_v63 = vsel %vm625_vm0, %v2702_v60, %v1278_v61 }
 0x1d9   : > { %2086 = vrot.lane.b32.xlu2 %v2803_v0, %s3886_s30 }
 0x1da   : > { %1609 = vrot.lane.b32.xlu1 %v1603_v4, %s3885_s5 }
 0x1db   : > { %v1426_v8 = vpop.permute.xlu2 %1425 }
 0x1e2   : > { %1658 = vperm.xlu1 %2696, %v2534_v10  }
 0x1e3   : > { %v1500_v3 = vpop.permute.xlu2 %1499 }
 0x1e4   : > { %v3454_v14 = vsel %vm972_vm8, %v1500_v3, %v2717_v11  ;;  %v2701_v11 = vunpack.i.l.bf16 %v3329_v20 }
 0x1ea   : > { %1735 = vrot.lane.b32.xlu1 %v2803_v0, %s3888_s24 }
 0x1eb   : > { %v1553_v15 = vpop.permute.xlu2 %1552 }
 0x1ec   : > { %v1380_v5 = vpop.permute.xlu1 %1379  ;;  %v1280_v26 = vpop.permute.xlu0 %1279 }
 0x1ed   : > { %v1282_v16 = vsel %vm625_vm0, %v1278_v61, %v1280_v26 }
 0x1f2   : > { %1852 = vrot.lane.b32.xlu1 %v2803_v0, %s3880_s21 }
 0x1f3   : > { %v1647_v25 = vpop.permute.xlu2 %1646 }
 0x1f4   : > { %v1424_v27 = vpop.permute.xlu1 %1423  ;;  %v1378_v32 = vpop.permute.xlu0 %1377  ;;  %v3464_v36 = vsel %vm1184_vm11, %v1647_v25, %v2727_v17 }
 0x1f5   : > { %v3467_v37 = vsel %vm841_vm7, %v2712_v24, %v1424_v27  ;;  %v3470_v38 = vsel %vm841_vm7, %v1424_v27, %v1426_v8 }
 0x1fb   : > { %v1449_v61 = vpop.permute.xlu2 %1448 }
 0x1fc   : > { %v1498_v41 = vpop.permute.xlu1 %1497  ;;  %v1555_v43 = vpop.permute.xlu0 %1554 }
 0x1fd   : > { %v3474_v0 = vsel %vm972_vm8, %v1498_v41, %v1500_v3  ;;  %v1558_v47 = vsel %vm1044_vm10, %v1553_v15, %v1555_v43  ;;  %v1559_v48 = vsel %vm1044_vm10, %v1555_v43, %v2722_v40  ;;  %v2706_v40 = vunpack.i.l.bf16 %v3363_v34 }
 0x1fe   : > { %v1562_v53 = vsel %vm3061_vm1, %v1558_v47, 0.0  ;;  %v1563_v55 = vsel %vm3065_vm2, %v1559_v48, 0.0 }
 0x1ff   : > { %v3482_v57 = vmul.f32 %v1567_v56, %v1562_v53  ;;  %v3484_v60 = vmul.f32 %v1567_v56, %v1563_v55 }
 0x203   : > { %v1345_v24 = vpop.permute.xlu2 %1344 }
 0x204   : > { %v1645_v4 = vpop.permute.xlu1 %1644  ;;  %v1309_v8 = vpop.permute.xlu0 %1308 }
 0x205   : > { %v3487_v10 = vsel %vm1184_vm11, %v1645_v4, %v1647_v25  ;;  %v1312_v3 = vsel %vm625_vm0, %v2701_v11, %v1309_v8 }
 0x206   : > { %v1316_v17 = vsel %vm3061_vm1, %v1312_v3, 0.0 }
 0x207   : > { %v1323_v27 = vmul.f32 %v3391_v44, %v1316_v17  ;;  %v2711_v17 = vunpack.i.l.bf16 %v3344_v23 }
 0x209   : > { %v1325_v20 = vadd.f32 %v1323_v27, %v3349_v1 }
 0x20b   : > { %v3503_v4 = vpop.permute.xlu2 %1577 }
 0x20c   : > { %v1311_v15 = vpop.permute.xlu1 %1310  ;;  %v1362_v26 = vpop.permute.xlu0 %1361 }
 0x20d   : > { %v1365_v56 = vsel %vm638_vm3, %v3339_v22, %v1362_v26  ;;  %v1313_v27 = vsel %vm625_vm0, %v1309_v8, %v1311_v15 }
 0x20e   : > { %v1369_v25 = vmul.f32 %v1365_v56, %v3406_v50  ;;  %v1285_v56 = vsel %vm3061_vm1, %v3435_v63, 0.0 }
 0x210   : > { %v1371_v53 = vadd.f32 %v1369_v25, %v1325_v20  ;;  %v1286_v25 = vsel %vm3065_vm2, %v1282_v16, 0.0 }
 0x211   : > { %v1293_v15 = vmul.f32 %v3331_v21, %v1286_v25 }
 0x213   : > { %v3505_v3 = vpop.permute.xlu2 %1628 }
 0x214   : > { %v1364_v41 = vpop.permute.xlu1 %1363  ;;  %v1401_v43 = vpop.permute.xlu0 %1400 }
 0x215   : > { %v1404_v47 = vsel %vm769_vm5, %v2706_v40, %v1401_v43 }
 0x216   : > { %v1408_v48 = vsel %vm3098_vm4, %v1404_v47, 0.0  ;;  %v2707_v47 = vunpack.i.h.bf16 %v3363_v34  ;;  %v1366_v34 = vsel %vm638_vm3, %v1362_v26, %v1364_v41 }
 0x217   : > { %v1415_v55 = vmul.f32 %v3388_v42, %v1408_v48  ;;  %v1292_v48 = vmul.f32 %v3331_v21, %v1285_v56 }
 0x218   : > { %v1381_v16 = vsel %vm769_vm5, %v2707_v47, %v1378_v32 }
 0x219   : > { %v1417_v22 = vadd.f32 %v1415_v55, %v1371_v53  ;;  %v1317_v53 = vsel %vm3065_vm2, %v1313_v27, 0.0  ;;  %v1382_v55 = vsel %vm769_vm5, %v1378_v32, %v1380_v5  ;;  %v1385_v21 = vsel %vm3098_vm4, %v1381_v16, 0.0 }
 0x21a   : > { %v1386_v5 = vsel %vm3122_vm6, %v1382_v55, 0.0  ;;  %v1370_v32 = vmul.f32 %v1366_v34, %v3406_v50  ;;  %v2721_v55 = vunpack.i.l.bf16 %v3419_v9 }
 0x21b   : > { %v3547_v41 = vpop.permute.xlu2 %1669 }
 0x21c   : > { %v1403_v11 = vpop.permute.xlu1 %1402  ;;  %v1582_v9 = vsel %vm1044_vm10, %v3503_v4, %v2721_v55 }
 0x21d   : > { %v1405_v63 = vsel %vm769_vm5, %v1401_v43, %v1403_v11  ;;  %v1294_v11 = vadd.f32 %v1292_v48, %v3378_v35 }
 0x21e   : > { %v1409_v43 = vsel %vm3122_vm6, %v1405_v63, 0.0 }
 0x21f   : > { %v1416_v47 = vmul.f32 %v3388_v42, %v1409_v43 }
 0x224   : > { %v1447_v40 = vpop.permute.xlu1 %1446 }
 0x225   : > { %v1450_v20 = vsel %vm841_vm7, %v2711_v17, %v1447_v40  ;;  %v1324_v17 = vmul.f32 %v3391_v44, %v1317_v53  ;;  %v1451_v56 = vsel %vm841_vm7, %v1447_v40, %v1449_v61  ;;  %v1530_v44 = vpop.permute.xlu0 %1529  ;;  %v1432_v61 = vsel %vm3065_vm2, %v3470_v38, 0.0 }
 0x226   : > { %v1454_v23 = vsel %vm3061_vm1, %v1450_v20, 0.0  ;;  %v1485_v20 = vmul.f32 %v3398_v46, %v3351_v30  ;;  %v1431_v30 = vsel %vm3061_vm1, %v3467_v37, 0.0  ;;  %v1295_v40 = vadd.f32 %v1293_v15, %v3378_v35 }
 0x227   : > { %v1461_v8 = vmul.f32 %v3382_v39, %v1454_v23  ;;  %v1326_v50 = vadd.f32 %v1324_v17, %v3349_v1  ;;  %v1392_v53 = vmul.f32 %v3370_v2, %v1385_v21  ;;  %v1393_v38 = vmul.f32 %v3370_v2, %v1386_v5 }
 0x228   : > { %v1438_v35 = vmul.f32 %v3417_v49, %v1431_v30  ;;  %v1439_v1 = vmul.f32 %v3417_v49, %v1432_v61  ;;  %v1507_v2 = vsel %vm3098_vm4, %v3474_v0, 0.0  ;;  %v1472_v49 = vmul.f32 %v3393_v45, %v3319_v18 }
 0x229   : > { %v1463_v27 = vadd.f32 %v1461_v8, %v1417_v22  ;;  %v1455_v22 = vsel %vm3065_vm2, %v1451_v56, 0.0  ;;  %v1372_v8 = vadd.f32 %v1370_v32, %v1326_v50  ;;  %v2716_v56 = vunpack.i.l.bf16 %v3413_v54  ;;  %v1612_v54 = vpop.permute.xlu2 %1611 }
 0x22a   : > { %v1462_v16 = vmul.f32 %v3382_v39, %v1455_v22  ;;  %v1473_v39 = vmul.f32 %v3393_v45, %v3321_v19  ;;  %v2726_v19 = vunpack.i.l.bf16 %v3442_v7  ;;  %v1486_v5 = vmul.f32 %v3398_v46, %v3361_v33 }
 0x22b   : > { %v3539_v26 = vadd.f32 %v1485_v20, %v1463_v27  ;;  %v1514_v20 = vmul.f32 %v3428_v58, %v1507_v2  ;;  %v1586_v45 = vsel %vm3065_vm2, %v1582_v9, 0.0 }
 0x22c   : > { %v1343_v25 = vpop.permute.xlu1 %1342  ;;  %v1674_v61 = vsel %vm1184_vm11, %v3547_v41, %v2726_v19  ;;  %v1593_v50 = vmul.f32 %v3440_v6, %v1586_v45 }
 0x22d   : > { %v1346_v48 = vsel %vm638_vm3, %v3359_v31, %v1343_v25  ;;  %v1347_v37 = vsel %vm638_vm3, %v1343_v25, %v1345_v24  ;;  %v1508_v31 = vsel %vm3122_vm6, %v3454_v14, 0.0  ;;  %v1418_v24 = vadd.f32 %v1416_v47, %v1372_v8  ;;  %v1631_v21 = vpop.permute.xlu0 %1630 }
 0x22e   : > { %v1350_v23 = vadd.f32 %v1346_v48, %v1294_v11  ;;  %v1351_v63 = vadd.f32 %v1347_v37, %v1295_v40  ;;  %v1515_v14 = vmul.f32 %v3428_v58, %v1508_v31  ;;  %v1635_v33 = vsel %vm1116_vm9, %v1631_v21, %v3449_v12 }
 0x22f   : > { %v1464_v27 = vadd.f32 %v1462_v16, %v1418_v24  ;;  %v1678_v48 = vsel %vm3122_vm6, %v1674_v61, 0.0 }
 0x230   : > { %v1394_v15 = vadd.f32 %v1392_v53, %v1350_v23  ;;  %v1395_v42 = vadd.f32 %v1393_v38, %v1351_v63  ;;  %v1685_v23 = vmul.f32 %v3451_v13, %v1678_v48 }
 0x231   : > { %v1488_v22 = vadd.f32 %v1486_v5, %v1464_v27 }
 0x232   : > { %v1440_v34 = vadd.f32 %v1438_v35, %v1394_v15  ;;  %v1441_v17 = vadd.f32 %v1439_v1, %v1395_v42  ;;  %v1706_v35 = vpop.permute.xlu2 %1705  ;;  %v1634_v42 = vsel %vm1116_vm9, %v3505_v3, %v1631_v21 }
 0x234   : > { %v1475_v0 = vadd.f32 %v1473_v39, %v1441_v17  ;;  %v1532_v43 = vpop.permute.xlu1 %1531  ;;  %v1474_v11 = vadd.f32 %v1472_v49, %v1440_v34 }
 0x235   : > { %v1536_v18 = vsel %vm972_vm8, %v1532_v43, %v2716_v56  ;;  %v1535_v7 = vsel %vm972_vm8, %v1530_v44, %v1532_v43  ;;  %v1639_v44 = vmul.f32 %v1635_v33, %v3430_v59  ;;  %v1614_v56 = vpop.permute.xlu0 %1613  ;;  %v2274_v33 = vld [vmem:[%s3827_s14 + $0x8] sm:$0xff] }
 0x236   : > { %v1540_v32 = vsel %vm3122_vm6, %v1536_v18, 0.0  ;;  %v1516_v30 = vadd.f32 %v1514_v20, %v1474_v11  ;;  %v1517_v58 = vadd.f32 %v1515_v14, %v1475_v0  ;;  %v1539_v37 = vsel %vm3098_vm4, %v1535_v7, 0.0  ;;  %v2255_v7 = vld [vmem:[%s3825_s12] sm:$0xff] }
 0x237   : > { %v1547_v40 = vmul.f32 %v3408_v52, %v1540_v32  ;;  %v1546_v12 = vmul.f32 %v3408_v52, %v1539_v37  ;;  %v1616_v27 = vsel %vm1116_vm9, %v1612_v54, %v1614_v56  ;;  %v2561_v56 = vld [vmem:[%s3823_s10 + $0x30] sm:$0xff] }
 0x238   : > { %v1571_v46 = vadd.f32 %v3482_v57, %v1516_v30  ;;  %v1572_v25 = vadd.f32 %v3484_v60, %v1517_v58 }
 0x239   : > { %v1549_v47 = vadd.f32 %v1547_v40, %v1488_v22  ;;  %v1548_v1 = vadd.f32 %v1546_v12, %v3539_v26  ;;  %v1722_v22 = vld [vmem:[%s3824_s11] sm:$0xff] }
 0x23a   : > { %v1620_v0 = vadd.f32 %v1616_v27, %v1572_v25  ;;  %v2273_v40 = vld [vmem:[%s3827_s14] sm:$0xff]  ;;  %v2342_v25 = vld [vmem:[%s3828_s15 + $0x8] sm:$0xff]  ;;  %v2087_v48 = vpop.permute.xlu2 %2086 }
 0x23b   : > { %v1595_v53 = vadd.f32 %v1593_v50, %v1549_v47  ;;  %v2357_v50 = vld [vmem:[%s3829_s16] sm:$0xff]  ;;  %v2358_v47 = vld [vmem:[%s3829_s16 + $0x8] sm:$0xff] }
 0x23c   : > { %v1576_v38 = vpop.permute.xlu1 %1575 }
 0x23d   : > { %v1641_v57 = vadd.f32 %v1639_v44, %v1595_v53  ;;  %v1581_v60 = vsel %vm1044_vm10, %v1576_v38, %v3503_v4  ;;  %v1638_v4 = vmul.f32 %v1634_v42, %v3430_v59  ;;  %v1694_v5 = vpop.permute.xlu0 %1693  ;;  %v1728_v53 = vld [vmem:[%s3823_s10] sm:$0xff] }
 0x23e   : > { %v1585_v63 = vsel %vm3061_vm1, %v1581_v60, 0.0  ;;  %v2543_v60 = vld [vmem:[%s3823_s10 + $0x10] sm:$0xff] }
 0x23f   : > { %v1687_v8 = vadd.f32 %v1685_v23, %v1641_v57  ;;  %v1592_v16 = vmul.f32 %v3440_v6, %v1585_v63 }
 0x241   : > { %vm1702_vm14 = vcmp.gt.f32.partialorder %v1687_v8, 0.0  ;;  %v1709_v15 = vmul.f32 %v1706_v35, %v1687_v8  ;;  %v1594_v52 = vadd.f32 %v1592_v16, %v1548_v1 }
 0x243   : > { %v1711_v55 = vsel %vm1702_vm14, %v1687_v8, %v1709_v15  ;;  %v1640_v39 = vadd.f32 %v1638_v4, %v1594_v52  ;;  %vm1747_vm14 = vcmask 64512   ;;  %v2553_v8 = vld [vmem:[%s3823_s10 + $0x20] sm:$0xff]  ;;  %v2540_v52 = vld [vmem:[%s3823_s10 + $0x8] sm:$0xff] }
 0x244   : > { %v1717_v31 = vrot.slane %v1711_v55, 4  ;;  %v1668_v2 = vpop.permute.xlu1 %1667 }
 0x245   : > { %v1673_v24 = vsel %vm1184_vm11, %v1668_v2, %v3547_v41  ;;  %v1654_v41 = vsel %vm3098_vm4, %v3487_v10, 0.0  ;;  %v1912_v63 = vpop.permute.xlu0 %1911 }
 0x246   : > { %1721 = vst [vmem:[#allocation2 + $0x8] sm:$0xf0] %v1717_v31  ;;  %v1677_v6 = vsel %vm3098_vm4, %v1673_v24, 0.0 }
 0x247   : > { %v1684_v26 = vmul.f32 %v3451_v13, %v1677_v6  ;;  %v1655_v13 = vsel %vm3122_vm6, %v3464_v36, 0.0  ;;  %v2738_v36 = vld [vmem:[#allocation2 + $0x28] sm:$0xff] }
 0x249   : > { %v1686_v34 = vadd.f32 %v1684_v26, %v1640_v39 }
 0x24b   : > { %vm1701_vm15 = vcmp.gt.f32.partialorder %v1686_v34, 0.0  ;;  %v1708_v17 = vmul.f32 %v1706_v35, %v1686_v34 }
 0x24c   : > { %v1610_v3 = vpop.permute.xlu1 %1609 }
 0x24d   : > { %v1710_v49 = vsel %vm1701_vm15, %v1686_v34, %v1708_v17  ;;  %v1615_v59 = vsel %vm1116_vm9, %v1610_v3, %v1612_v54  ;;  %v2548_v17 = vld [vmem:[%s3823_s10 + $0x18] sm:$0xff] }
 0x24e   : > { %v1716_v9 = vrot.slane %v1710_v49, 4  ;;  %v1619_v20 = vadd.f32 %v1615_v59, %v1571_v46  ;;  %v2341_v46 = vld [vmem:[%s3828_s15] sm:$0xff] }
 0x250   : > { %1720 = vst [vmem:[#allocation2 + $0x20] sm:$0xf0] %v1716_v9 }
 0x254   : > { %v1659_v14 = vpop.permute.xlu1 %1658 }
 0x255   : > { %v1661_v43 = vmul.f32 %v1659_v14, %v1654_v41  ;;  %v1662_v11 = vmul.f32 %v1659_v14, %v1655_v13  ;;  %v2556_v14 = vld [vmem:[%s3823_s10 + $0x28] sm:$0xff] }
 0x257   : > { %v1663_v19 = vadd.f32 %v1661_v43, %v1619_v20  ;;  %v1664_v21 = vadd.f32 %v1662_v11, %v1620_v0  ;;  %v2569_v11 = vld [vmem:[%s3823_s10 + $0x40] sm:$0xff] }
 0x259   : > { %vm1689_vm12 = vcmp.gt.f32.partialorder %v1663_v19, 0.0  ;;  %vm1690_vm13 = vcmp.gt.f32.partialorder %v1664_v21, 0.0  ;;  %v1696_v18 = vmul.f32 %v1694_v5, %v1663_v19  ;;  %v1697_v45 = vmul.f32 %v1694_v5, %v1664_v21 }
 0x25b   : > { %v1698_v54 = vsel %vm1689_vm12, %v1663_v19, %v1696_v18  ;;  %v1699_v32 = vsel %vm1690_vm13, %v1664_v21, %v1697_v45 }
 0x25c   : > { %1712 = vst [vmem:[#allocation2 + $0x20] sm:$0xf] %v1698_v54  ;;  %v1736_v37 = vpop.permute.xlu1 %1735 }
 0x25d   : > { %1713 = vst [vmem:[#allocation2 + $0x8] sm:$0xf] %v1699_v32  ;;  %v2566_v32 = vld [vmem:[%s3823_s10 + $0x38] sm:$0xff] }
 0x263   : > { %v1730_v10 = vld [vmem:[#allocation2 + $0x20] sm:$0xff] }
 0x264   : > { %v3624_v30 = vld [vmem:[#allocation2 + $0x8] sm:$0xff]  ;;  %1737 = vrot.lane.b32.xlu2 %v1730_v10, %s3888_s24  ;;  %v2728_v58 = vpack.i.bf16 %v1730_v10, %v2738_v36  ;;  %v1853_v23 = vpop.permute.xlu1 %1852 }
 0x265   : > { %1739 = vrot.lane.b32.xlu0 %v3624_v30, %s3888_s24  ;;  %v2733_v61 = vpack.i.bf16 %v3624_v30, %v1730_v10 }
 0x266   : > { %2729 = vrot.lane.b32.xlu1 %v2728_v58, %s3884_s8 }
 0x26c   : > { %1854 = vrot.lane.b32.xlu2 %v1730_v10, %s3880_s21 }
 0x26d   : > { %1856 = vrot.lane.b32.xlu0 %v3624_v30, %s3880_s21 }
 0x26e   : > { %1913 = vrot.lane.b32.xlu1 %v1730_v10, %s3881_s2 }
 0x274   : > { %1799 = vrot.lane.b32.xlu2 %v3624_v30, %s3884_s8 }
 0x275   : > { %2082 = vrot.lane.b32.xlu0 %v1730_v10, %s3886_s30 }
 0x276   : > { %2084 = vrot.lane.b32.xlu1 %v3624_v30, %s3886_s30  ;;  %s2584_s30 = sshll.u32 %s2925_s28, 5 }
 0x27c   : > { %1915 = vrot.lane.b32.xlu2 %v3624_v30, %s3881_s2  ;;  %s2467_s2 = sshll.u32 %s539_s22, 5 }
 0x27d   : > { %2023 = vrot.lane.b32.xlu0 %v1730_v10, %s3883_s23  ;;  %s541_s21 = scalar_lea.vmem [#allocation3], %s2467_s2 }
 0x27e   : > { %2025 = vrot.lane.b32.xlu1 %v3624_v30, %s3883_s23  ;;  %s2398_s28 = sshll.u32 %s541_s21, 4  ;;  %s2399_s28 = int_to_ptr.vmem [resolvable:$true] %s2398_s28 }
 0x284   : > { %2027 = vrot.lane.b32.xlu2 %v2738_v36, %s3883_s23 }
 0x285   : > { %2198 = vrot.lane.b32.xlu0 %v1730_v10, %s3887_s20 }
 0x286   : > { %2200 = vrot.lane.b32.xlu1 %v3624_v30, %s3887_s20 }
 0x28c   : > { %2202 = vrot.lane.b32.xlu2 %v2738_v36, %s3887_s20  ;;  %s2386_s20 = scalar_lea.sflag [#allocation4], %s539_s22 }
 0x28d   : > { %2734 = vrot.lane.b32.xlu0 %v2733_v61, %s3885_s5 }
 0x28e   : > { %2145 = vrot.lane.b32.xlu1 %v2738_v36, %s3885_s5 }
 0x294   : > { %1725 = vperm.xlu2 %2697, %v1722_v22  }
 0x295   : > { %2260 = vperm.xlu0 %2695, %v2255_v7  }
 0x296   : > { %2277 = vperm.xlu1 %2696, %v2273_v40  }
 0x29c   : > { %2282 = vperm.xlu2 %2697, %v2274_v33  }
 0x29d   : > { %2345 = vperm.xlu0 %2695, %v2341_v46  }
 0x29e   : > { %2350 = vperm.xlu1 %2696, %v2342_v25  }
 0x2a4   : > { %2365 = vperm.xlu2 %2697, %v2357_v50  }
 0x2a5   : > { %2370 = vperm.xlu0 %2695, %v2358_v47  }
 0x2be   : > { %v1738_v44 = vpop.permute.xlu2 %1737 }
 0x2bf   : > { %v1741_v38 = vsel %vm625_vm0, %v1736_v37, %v1738_v44 }
 0x2c0   : > { %2536 = vmatpush.msk.msrb.mxu2 %vm3061_vm1, %v1741_v38 }
 0x2c1   : > { %2537 = vmatmul.msk.f32.vlgmr.msrb.gmra.mxu2 %vm1747_vm14, %v1728_v53 }
 0x2c6   : > { %v1855_v12 = vpop.permute.xlu2 %1854 }
 0x2c7   : > { %v1858_v57 = vsel %vm769_vm5, %v1853_v23, %v1855_v12 }
 0x2c8   : > { %2544 = vmatpush.msk.msra.mxu2 %vm3098_vm4, %v1858_v57 }
 0x2c9   : > { %2545 = vmatmul.msk.f32.vlgmr.msra.gmra.mxu2 %vm1747_vm14, %v2543_v60 }
 0x2ca   : > { %1988 = vmatpush.msrb.mxu2 %v1730_v10 }
 0x2ce   : > { %v1800_v16 = vpop.permute.xlu2 %1799 }
 0x2d1   : > { %2554 = vmatmul.msk.f32.vlgmr.msrb.gmra.mxu2 %vm1747_vm14, %v2553_v8 }
 0x2d6   : > { %v1916_v24 = vpop.permute.xlu2 %1915 }
 0x2d7   : > { %v1740_v35 = vpop.permute.xlu0 %1739 }
 0x2d8   : > { %v1742_v1 = vsel %vm625_vm0, %v1738_v44, %v1740_v35  ;;  %v2730_v15 = vpop.permute.xlu1 %2729 }
 0x2d9   : > { %2538 = vmatpush.msk.msrb.mxu3 %vm3065_vm2, %v1742_v1  ;;  %v2732_v42 = vunpack.i.h.bf16 %v2730_v15  ;;  %v2731_v55 = vunpack.i.l.bf16 %v2730_v15 }
 0x2da   : > { %2539 = vmatmul.msk.f32.vlgmr.msrb.gmra.mxu3 %vm1747_vm14, %v1728_v53 }
 0x2db   : > { %v1801_v31 = vsel %vm638_vm3, %v2731_v55, %v2732_v42  ;;  %v1802_v2 = vsel %vm638_vm3, %v2732_v42, %v1800_v16 }
 0x2dc   : > { %1823 = vmatpush.msra.mxu0 %v1801_v31  ;;  %1843 = vmatpush.msra.mxu1 %v1802_v2 }
 0x2dd   : > { %2541 = vmatmul.msk.f32.vlgmr.msra.gmra.mxu0 %vm1747_vm14, %v2540_v52  ;;  %2542 = vmatmul.msk.f32.vlgmr.msra.gmra.mxu1 %vm1747_vm14, %v2540_v52 }
 0x2de   : > { %v2028_v27 = vpop.permute.xlu2 %2027 }
 0x2df   : > { %v1857_v4 = vpop.permute.xlu0 %1856 }
 0x2e0   : > { %v1859_v6 = vsel %vm769_vm5, %v1855_v12, %v1857_v4  ;;  %v1914_v39 = vpop.permute.xlu1 %1913 }
 0x2e1   : > { %2546 = vmatpush.msk.msra.mxu3 %vm3122_vm6, %v1859_v6  ;;  %v1917_v26 = vsel %vm841_vm7, %v1912_v63, %v1914_v39  ;;  %v1918_v34 = vsel %vm841_vm7, %v1914_v39, %v1916_v24 }
 0x2e2   : > { %2547 = vmatmul.msk.f32.vlgmr.msra.gmra.mxu3 %vm1747_vm14, %v2543_v60  ;;  %2549 = vmatpush.msk.msrb.mxu0 %vm3061_vm1, %v1917_v26 }
 0x2e3   : > { %2008 = vmatpush.msrb.mxu3 %v3624_v30  ;;  %2551 = vmatpush.msk.msrb.mxu1 %vm3065_vm2, %v1918_v34 }
 0x2e5   : > { %2550 = vmatmul.msk.f32.vlgmr.msrb.gmra.mxu0 %vm1747_vm14, %v2548_v17  ;;  %2552 = vmatmul.msk.f32.vlgmr.msrb.gmra.mxu1 %vm1747_vm14, %v2548_v17 }
 0x2e6   : > { %v2203_v29 = vpop.permute.xlu2 %2202 }
 0x2e7   : > { %v2083_v3 = vpop.permute.xlu0 %2082 }
 0x2e8   : > { %v2085_v49 = vpop.permute.xlu1 %2084 }
 0x2e9   : > { %v2088_v9 = vsel %vm1044_vm10, %v2083_v3, %v2085_v49  ;;  %v2089_v59 = vsel %vm1044_vm10, %v2085_v49, %v2087_v48  ;;  %v2267_v3 = vld [vmem:[%s3826_s13] sm:$0xff] }
 0x2ea   : > { %2555 = vmatmul.msk.f32.vlgmr.msrb.gmra.mxu3 %vm1747_vm14, %v2553_v8  ;;  %2562 = vmatpush.msk.msra.mxu2 %vm3061_vm1, %v2088_v9  ;;  %v2268_v9 = vld [vmem:[%s3826_s13 + $0x8] sm:$0xff] }
 0x2eb   : > { %2564 = vmatpush.msk.msra.mxu3 %vm3065_vm2, %v2089_v59  ;;  %2563 = vmatmul.msk.f32.vlgmr.msra.gmra.mxu2 %vm1747_vm14, %v2561_v56 }
 0x2ee   : > { %v1726_v7 = vpop.permute.xlu2 %1725 }
 0x2ef   : > { %v2024_v41 = vpop.permute.xlu0 %2023 }
 0x2f0   : > { %v2026_v13 = vpop.permute.xlu1 %2025 }
 0x2f1   : > { %v2029_v20 = vsel %vm972_vm8, %v2024_v41, %v2026_v13  ;;  %v2030_v0 = vsel %vm972_vm8, %v2026_v13, %v2028_v27  ;;  %v2269_v27 = vld [vmem:[%s2961_s19] sm:$0xff]  ;;  %v2270_v41 = vld [vmem:[%s2961_s19 + $0x8] sm:$0xff] }
 0x2f2   : > { %2565 = vmatmul.msk.f32.vlgmr.msra.gmra.mxu3 %vm1747_vm14, %v2561_v56  ;;  %2557 = vmatpush.msk.msra.mxu0 %vm3098_vm4, %v2029_v20 }
 0x2f3   : > { %2559 = vmatpush.msk.msra.mxu1 %vm3122_vm6, %v2030_v0  ;;  %2558 = vmatmul.msk.f32.vlgmr.msra.gmra.mxu0 %vm1747_vm14, %v2556_v14 }
 0x2f4   : > { %2560 = vmatmul.msk.f32.vlgmr.msra.gmra.mxu1 %vm1747_vm14, %v2556_v14 }
 0x2f6   : > { %v2283_v59 = vpop.permute.xlu2 %2282 }
 0x2f7   : > { %v2199_v28 = vpop.permute.xlu0 %2198 }
 0x2f8   : > { %v2201_v43 = vpop.permute.xlu1 %2200 }
 0x2f9   : > { %v2204_v19 = vsel %vm1184_vm11, %v2199_v28, %v2201_v43  ;;  %v2205_v21 = vsel %vm1184_vm11, %v2201_v43, %v2203_v29 }
 0x2fa   : > { %2570 = vmatpush.msk.msrb.mxu2 %vm3098_vm4, %v2204_v19  ;;  %2572 = vmatpush.msk.msrb.mxu3 %vm3122_vm6, %v2205_v21 }
 0x2fb   : > { %2571 = vmatmul.msk.f32.vlgmr.msrb.gmra.mxu2 %vm1747_vm14, %v2569_v11  ;;  %2573 = vmatmul.msk.f32.vlgmr.msrb.gmra.mxu3 %vm1747_vm14, %v2569_v11 }
 0x2ff   : > { %v2735_v5 = vpop.permute.xlu0 %2734 }
 0x300   : > { %v2737_v18 = vunpack.i.h.bf16 %v2735_v5  ;;  %v2736_v45 = vunpack.i.l.bf16 %v2735_v5  ;;  %v2146_v54 = vpop.permute.xlu1 %2145  ;;  %v2271_v5 = vld [vmem:[%s2961_s19 + $0x10] sm:$0xff] }
 0x302   : > { %v2148_v10 = vsel %vm1116_vm9, %v2737_v18, %v2146_v54  ;;  %v2147_v51 = vsel %vm1116_vm9, %v2736_v45, %v2737_v18  ;;  %v2272_v18 = vld [vmem:[%s2961_s19 + $0x18] sm:$0xff]  ;;  %v2366_v45 = vpop.permute.xlu2 %2365  ;;  %s2397_s19 = scalar_lea.hbm %s3830_s17, %s2584_s30 }
 0x303   : > { %2169 = vmatpush.msrb.mxu0 %v2147_v51  ;;  %2189 = vmatpush.msrb.mxu1 %v2148_v10  ;;  %v2287_v10 = vmul.f32 %v2283_v59, %v2271_v5  ;;  %v2288_v51 = vmul.f32 %v2283_v59, %v2272_v18  ;;  %s2400_s26 = sshll.u32 %s2397_s19, 4  ;;  %s2401_s26 = int_to_ptr.hbm [resolvable:$true] %s2400_s26 }
 0x304   : > { %2567 = vmatmul.msk.f32.vlgmr.msrb.gmra.mxu0 %vm1747_vm14, %v2566_v32  ;;  %2568 = vmatmul.msk.f32.vlgmr.msrb.gmra.mxu1 %vm1747_vm14, %v2566_v32  ;;  %s2753_s0 = sshra.s32 %s2401_s26, 4  ;;  %s2754_s0 = int_to_ptr.hbm [resolvable:$true] %s2753_s0 }
 0x305   : > { %s2755_s5 = scalar_lea.hbm %s2754_s0, 32  ;;  %p2760_p0 = scmp.lt.s32.totalorder %s2754_s0, %s3830_s17 }
 0x306   : > { %p2756_p11 = scmp.ne.s32.totalorder %s2754_s0, %s2755_s5  ;;  %p2761_p1 = scmp.lt.s32.totalorder %s2759_s3, %s2755_s5 }
 0x307   : > { %v2261_v26 = vpop.permute.xlu0 %2260 }
 0x308   : > { %v2278_v13 = vpop.permute.xlu1 %2277  ;;  %p2757_p12 = pnand %p2756_p11, %p2942_p5  ;;  %p2762_p2 = por %p2761_p1, %p2760_p0 }
 0x309   : > { %v2285_v14 = vmul.f32 %v2278_v13, %v2269_v27  ;;  %v2286_v20 = vmul.f32 %v2278_v13, %v2270_v41 }
 0x30a   : > { %p2758_p13 = pneg %p2757_p12 }
 0x30c   : > { %p2763_p3 = pnand %p2762_p2, %p2758_p13 }
 0x30f   : > { %v2346_v11 = vpop.permute.xlu0 %2345 }
 0x344   : > { %v1768_v30 = vpop.f32.mrf.mxu2 }
 0x345   : > { %v1791_v40 = vadd.f32 %v1768_v30, %v1726_v7 }
 0x34c   : > { %v1884_v58 = vpop.f32.mrf.mxu2 }
 0x354   : > { %v1990_v50 = vpop.f32.mrf.mxu2 }
 0x35a   : > { %v1825_v61 = vpop.f32.mrf.mxu0  ;;  %v1845_v22 = vpop.f32.mrf.mxu1 }
 0x35b   : > { %v1848_v46 = vadd.f32 %v1825_v61, %v1791_v40 }
 0x35d   : > { %v1788_v62 = vpop.f32.mrf.mxu3  ;;  %v1907_v37 = vadd.f32 %v1884_v58, %v1848_v46  ;;  %v2371_v46 = vpop.permute.xlu0 %2370 }
 0x35e   : > { %v1792_v25 = vadd.f32 %v1788_v62, %v1726_v7  ;;  %v2351_v7 = vpop.permute.xlu1 %2350 }
 0x360   : > { %v1849_v44 = vadd.f32 %v1845_v22, %v1792_v25 }
 0x362   : > { %v1943_v47 = vpop.f32.mrf.mxu0  ;;  %v1963_v48 = vpop.f32.mrf.mxu1 }
 0x363   : > { %v1966_v53 = vadd.f32 %v1943_v47, %v1907_v37 }
 0x365   : > { %v1904_v36 = vpop.f32.mrf.mxu3  ;;  %v2013_v63 = vadd.f32 %v1990_v50, %v1966_v53 }
 0x366   : > { %v1908_v38 = vadd.f32 %v1904_v36, %v1849_v44 }
 0x368   : > { %v1967_v8 = vadd.f32 %v1963_v48, %v1908_v38 }
 0x36d   : > { %v2010_v33 = vpop.f32.mrf.mxu3 }
 0x36e   : > { %v2114_v23 = vpop.f32.mrf.mxu2  ;;  %v2014_v16 = vadd.f32 %v2010_v33, %v1967_v8 }
 0x370   : > { %v2055_v57 = vpop.f32.mrf.mxu0 }
 0x371   : > { %v2075_v60 = vpop.f32.mrf.mxu1  ;;  %v2078_v35 = vadd.f32 %v2055_v57, %v2013_v63 }
 0x372   : > { %v2079_v1 = vadd.f32 %v2075_v60, %v2014_v16 }
 0x373   : > { %v2137_v15 = vadd.f32 %v2114_v23, %v2078_v35 }
 0x375   : > { %v2134_v12 = vpop.f32.mrf.mxu3 }
 0x376   : > { %v2138_v42 = vadd.f32 %v2134_v12, %v2079_v1 }
 0x37e   : > { %v2230_v55 = vpop.f32.mrf.mxu2  ;;  %v2250_v52 = vpop.f32.mrf.mxu3 }
 0x381   : > { %v2171_v31 = vpop.f32.mrf.mxu0  ;;  %v2191_v2 = vpop.f32.mrf.mxu1 }
 0x382   : > { %v2194_v4 = vadd.f32 %v2171_v31, %v2137_v15  ;;  %v2195_v24 = vadd.f32 %v2191_v2, %v2138_v42 }
 0x384   : > { %v2253_v6 = vadd.f32 %v2230_v55, %v2194_v4  ;;  %v2254_v39 = vadd.f32 %v2250_v52, %v2195_v24 }
 0x386   : > { %vm2256_vm0 = vcmp.gt.f32.partialorder %v2253_v6, 0.0  ;;  %v2263_v34 = vmul.f32 %v2261_v26, %v2253_v6  ;;  %vm2257_vm1 = vcmp.gt.f32.partialorder %v2254_v39, 0.0  ;;  %v2264_v17 = vmul.f32 %v2261_v26, %v2254_v39 }
 0x388   : > { %v2265_v49 = vsel %vm2256_vm0, %v2253_v6, %v2263_v34  ;;  %v2266_v56 = vsel %vm2257_vm1, %v2254_v39, %v2264_v17 }
 0x389   : > { %2310 = vmatpush.msra.mxu0 %v2265_v49  ;;  %2333 = vmatpush.msra.mxu1 %v2266_v56 }
 0x38a   : > { %2574 = vmatmul.msk.f32.vlgmr.msra.gmra.mxu0 %vm1747_vm14, %v2267_v3  ;;  %2576 = vmatmul.msk.f32.vlgmr.msra.gmra.mxu1 %vm1747_vm14, %v2267_v3 }
 0x392   : > { %2575 = vmatmul.msk.f32.gmra.mxu0 %vm1747_vm14, %v2268_v9  ;;  %2577 = vmatmul.msk.f32.gmra.mxu1 %vm1747_vm14, %v2268_v9 }
 0x407   : > { %v2312_v0 = vpop.f32.mrf.mxu0  ;;  %v2335_v28 = vpop.f32.mrf.mxu1 }
 0x408   : > { %v2313_v29 = vadd.f32 %v2312_v0, %v2285_v14  ;;  %v2336_v43 = vadd.f32 %v2335_v28, %v2286_v20 }
 0x40a   : > { %v2353_v19 = vadd.f32 %v2346_v11, %v2313_v29  ;;  %v2354_v21 = vadd.f32 %v2346_v11, %v2336_v43 }
 0x40c   : > { %vm2359_vm2 = vcmp.gt.f32.partialorder %v2353_v19, 0.0  ;;  %v2373_v54 = vmul.f32 %v2366_v45, %v2353_v19  ;;  %vm2360_vm3 = vcmp.gt.f32.partialorder %v2354_v21, 0.0  ;;  %v2374_v32 = vmul.f32 %v2366_v45, %v2354_v21 }
 0x40e   : > { %v2377_v62 = vsel %vm2359_vm2, %v2353_v19, %v2373_v54  ;;  %v2378_v30 = vsel %vm2360_vm3, %v2354_v21, %v2374_v32 }
 0x40f   : > { %2381 = vst [vmem:[%s541_s21] sm:$0xff] %v2377_v62  ;;  %v2315_v36 = vpop.f32.mrf.mxu0  ;;  %v2338_v58 = vpop.f32.mrf.mxu1 }
 0x410   : > { %2382 = vst [vmem:[%s541_s21 + $0x8] sm:$0xff] %v2378_v30  ;;  %v2316_v61 = vadd.f32 %v2315_v36, %v2287_v10  ;;  %v2339_v22 = vadd.f32 %v2338_v58, %v2288_v51 }
 0x412   : > { %v2355_v40 = vadd.f32 %v2351_v7, %v2316_v61  ;;  %v2356_v33 = vadd.f32 %v2351_v7, %v2339_v22 }
 0x414   : > { %vm2361_vm4 = vcmp.gt.f32.partialorder %v2355_v40, 0.0  ;;  %v2375_v25 = vmul.f32 %v2371_v46, %v2355_v40  ;;  %vm2362_vm5 = vcmp.gt.f32.partialorder %v2356_v33, 0.0  ;;  %v2376_v50 = vmul.f32 %v2371_v46, %v2356_v33 }
 0x416   : > { %v2379_v47 = vsel %vm2361_vm4, %v2355_v40, %v2375_v25  ;;  %v2380_v48 = vsel %vm2362_vm5, %v2356_v33, %v2376_v50 }
 0x417   : > { %2383 = vst [vmem:[%s541_s21 + $0x10] sm:$0xff] %v2379_v47 }
 0x418   : > { %2384 = vst [vmem:[%s541_s21 + $0x18] sm:$0xff] %v2380_v48 }
 0x419   : > { %2766 = shalt.err (!%p2763_p3)
}
 0x41a   : > { %s2813_s22 = smov 256  }
 0x41b   : > { %2585 = dma.vmem_to_hbm [thread:$0]  (%p2942_p5), %s2399_s28, 512, %s2401_s26, %s2386_s20, %s2813_s22, %s2813_s22, %s3884_s8  }
 0x41c PF: > { %s3889_s21 = sld [smem:[#allocation6_spill]]  ;;  %p2591_p4 = scmp.ge.s32.totalorder %s2801_s27, 2 }
 0x41e   : > { %p2588_p7 = pnand %p2591_p4, %p2946_p6 }
 0x420   : > { %p2589_p8 = pneg %p2588_p7 }
 0x422   : > { %s2415_s23 = sand.u32 1, %s3889_s21  }
 0x423   : > { %s2416_s19 = scalar_lea.sflag [#allocation4], %s2415_s23 }
 0x424   : > { %2784 = dma.done.wait (%p2589_p8), %s2416_s19, 512  }
 0x425   : > { %2786 = vsyncadd (%p2589_p8), %s2416_s19, 4294966784  ;;  %s3891_s27 = sld [smem:[#allocation8_spill]]  ;;  %s3894_s24 = smov %s2793_s25 }
 0x426   : > { %s3892_s0 = sld [smem:[#allocation7_spill]] }
 0x427   : > { %s3893_s26 = sld [smem:[#allocation9_spill]] }
 0x42b   : > { %p27_p9 = scmp.ge.s32.totalorder %s3891_s27, 4  }
 0x42c   : > { %s3895_s25 = smov %s3892_s0 }
 0x42d   :  { %29 = sbr.rel (!%p27_p9) target bundleno = 10 (0xa), region = 155 }
 0x432   :  { %2422 = vsyncpa [#allocation4], 1 }
 0x433   :  { %2424 = vsyncpa [#allocation4 + $0x1], 1 }

</bundles_post_ra>
